<compile_context>
chip_gen: v7x
topology: tpu7x:2x2x1
jax: 0.10.0
libtpu: 0.0.40
codegen_flags: <defaults>
</compile_context>

<pallas_src>
import numpy as np
import jax
import jax.numpy as jnp
from jax.experimental import pallas as pl
from jax.experimental.pallas import tpu as pltpu


_VMEM_LIMIT = 32 * 1024 * 1024   # safe on v5e/v6e (128 MiB) and v7x (64 MiB)
_MAX_ROW_TILE = 1024             # rows per grid step (multiple of 8)


def _round_up(n, m):
    return ((n + m - 1) // m) * m


def _choose_tile(n):
    """Row tile: multiple of 8, capped at _MAX_ROW_TILE."""
    return min(_MAX_ROW_TILE, _round_up(max(n, 1), 8))


def _pad_rows(a, n_pad):
    n = a.shape[0]
    if n == n_pad:
        return a
    pad = [(0, n_pad - n)] + [(0, 0)] * (a.ndim - 1)
    return jnp.pad(a, pad)


def _compiler_params():
    return pltpu.CompilerParams(
        dimension_semantics=("parallel",),
        vmem_limit_bytes=_VMEM_LIMIT,
    )


# ---------------------------------------------------------------------------
# Pallas kernels
# ---------------------------------------------------------------------------

def linear_kernel(x_ref, w_ref, b_ref, o_ref):
    """o = x @ W + b for one row tile."""
    o_ref[...] = (
        jnp.dot(x_ref[...], w_ref[...], preferred_element_type=jnp.float32)
        + b_ref[...]
    )


def _layer_hidden(feat_ref, sub_ref, d_ref,
                  w1d_ref, b1d_ref, w2dr_ref, b2d_ref,
                  wha_ref, whb_ref, bh_ref):
    """relu(linear_hidden([subset*d_new, self_feat])) for ALL K anchor sets.

    Returns h of shape [TM, K, H] (f32).  One batched MXU matmul for the
    subset half, one [TM,Fin]x[Fin,H] matmul for the shared self half;
    dist_compute (Nonlinear(1,H,1)) runs on the VPU/XLU.
    """
    tm, k_sets, fin = sub_ref.shape
    h = whb_ref.shape[1]

    # self half of linear_hidden (shared across all K anchor sets)
    self_h = (
        jnp.dot(feat_ref[...], whb_ref[...], preferred_element_type=jnp.float32)
        + bh_ref[...]
    )                                                              # [TM, H]

    # dist_compute for all K anchors at once (VPU mul/relu + lane reduce)
    d = d_ref[...]                                                 # [TM, K] f32
    hd = jnp.maximum(d[:, :, None] * w1d_ref[...][None] + b1d_ref[...][None], 0.0)
    d_new = jnp.sum(hd * w2dr_ref[...][None], axis=-1) + b2d_ref[...]   # [TM, K]

    # one batched MXU matmul for the K subset messages
    msgs = (sub_ref[...].astype(jnp.float32) * d_new[:, :, None]).reshape(
        tm * k_sets, fin)
    hk = jnp.dot(msgs.astype(jnp.bfloat16), wha_ref[...],
                 preferred_element_type=jnp.float32).reshape(tm, k_sets, h)
    return jnp.maximum(hk + self_h[:, None, :], 0.0)               # [TM, K, H]


def pgnn_struct_kernel(feat_ref, sub_ref, d_ref,
                       w1d_ref, b1d_ref, w2dr_ref, b2d_ref,
                       wha_ref, whb_ref, bh_ref,
                       struct_ref):
    """conv_first specialization: only out_structure = mean_k(h_k)."""
    hk = _layer_hidden(feat_ref, sub_ref, d_ref,
                       w1d_ref, b1d_ref, w2dr_ref, b2d_ref,
                       wha_ref, whb_ref, bh_ref)
    k_sets = sub_ref.shape[1]
    struct_ref[...] = jnp.sum(hk, axis=1) * (1.0 / k_sets)


def pgnn_pos_kernel(feat_ref, sub_ref, d_ref,
                    w1d_ref, b1d_ref, w2dr_ref, b2d_ref,
                    wha_ref, whb_ref, bh_ref, wpr_ref, bp_ref,
                    pos_ref):
    """conv_out specialization: out_position [TM, K] with fused L2 normalize."""
    hk = _layer_hidden(feat_ref, sub_ref, d_ref,
                       w1d_ref, b1d_ref, w2dr_ref, b2d_ref,
                       wha_ref, whb_ref, bh_ref)
    # linear_out_position as an H lane-reduce for all K columns at once
    pos = jnp.sum(hk * wpr_ref[...][None], axis=-1) + bp_ref[...]   # [TM, K]
    # fused F.normalize(p=2, dim=-1): x / max(||x||_2, eps); exact divide (cold)
    norm = jnp.sqrt(jnp.sum(pos * pos, axis=-1, keepdims=True))
    pos_ref[...] = pos / jnp.maximum(norm, 1e-12)


# ---------------------------------------------------------------------------
# Wrappers (pallas_call plumbing)
# ---------------------------------------------------------------------------

def linear(x, w, b):
    n, in_dim = x.shape
    out_dim = w.shape[1]
    tm = _choose_tile(n)
    n_pad = _round_up(n, tm)
    xp = _pad_rows(x, n_pad)
    out = pl.pallas_call(
        linear_kernel,
        out_shape=jax.ShapeDtypeStruct((n_pad, out_dim), jnp.float32),
        grid=(n_pad // tm,),
        in_specs=[
            pl.BlockSpec((tm, in_dim), lambda i: (i, 0)),
            pl.BlockSpec(w.shape, lambda i: (0, 0)),
            pl.BlockSpec(b.shape, lambda i: (0, 0)),
        ],
        out_specs=pl.BlockSpec((tm, out_dim), lambda i: (i, 0)),
        compiler_params=_compiler_params(),
    )(xp, w, b)
    return out[:n]


def _layer_prep(feature, dists_max, dists_argmax, p, n_pad):
    """Node-major subset gather + bf16 casts + weight split, padded to n_pad."""
    fin = feature.shape[1]
    feat_bf = feature.astype(jnp.bfloat16)
    # node-major contiguous subset gather: [N, K, Fin]
    # NOTE: assumes dists_argmax values lie in [0, N); XLA gather clamps OOB.
    sub = jnp.take(feat_bf, dists_argmax, axis=0)
    feat_bf = _pad_rows(feat_bf, n_pad)
    sub = _pad_rows(sub, n_pad)
    dists = _pad_rows(dists_max.astype(jnp.float32), n_pad)
    wh_a = p["wh"][:fin].astype(jnp.bfloat16)   # acts on subset * d_new
    wh_b = p["wh"][fin:].astype(jnp.bfloat16)   # acts on the self feature
    w2dr = p["w2d"].reshape(1, -1)              # [1, H] row for the lane reduce
    return feat_bf, sub, dists, wh_a, wh_b, w2dr


def pgnn_layer_struct(feature, dists_max, dists_argmax, p):
    n, fin = feature.shape
    k = dists_max.shape[1]
    h = p["wh"].shape[1]
    tm = _choose_tile(n)
    n_pad = _round_up(n, tm)
    feat_bf, sub, dists, wh_a, wh_b, w2dr = _layer_prep(
        feature, dists_max, dists_argmax, p, n_pad)

    weights = (p["w1d"], p["b1d"], w2dr, p["b2d"], wh_a, wh_b, p["bh"])
    weight_specs = [pl.BlockSpec(a.shape, lambda i: (0, 0)) for a in weights]
    out = pl.pallas_call(
        pgnn_struct_kernel,
        out_shape=jax.ShapeDtypeStruct((n_pad, h), jnp.float32),
        grid=(n_pad // tm,),
        in_specs=[
            pl.BlockSpec((tm, fin), lambda i: (i, 0)),
            pl.BlockSpec((tm, k, fin), lambda i: (i, 0, 0)),
            pl.BlockSpec((tm, k), lambda i: (i, 0)),
            *weight_specs,
        ],
        out_specs=pl.BlockSpec((tm, h), lambda i: (i, 0)),
        compiler_params=_compiler_params(),
    )(feat_bf, sub, dists, *weights)
    return out[:n]


def pgnn_layer_pos_normalized(feature, dists_max, dists_argmax, p):
    n, fin = feature.shape
    k = dists_max.shape[1]
    tm = _choose_tile(n)
    n_pad = _round_up(n, tm)
    feat_bf, sub, dists, wh_a, wh_b, w2dr = _layer_prep(
        feature, dists_max, dists_argmax, p, n_pad)
    wpr = p["wp"].reshape(1, -1)

    weights = (p["w1d"], p["b1d"], w2dr, p["b2d"], wh_a, wh_b, p["bh"],
               wpr, p["bp"])
    weight_specs = [pl.BlockSpec(a.shape, lambda i: (0, 0)) for a in weights]
    out = pl.pallas_call(
        pgnn_pos_kernel,
        out_shape=jax.ShapeDtypeStruct((n_pad, k), jnp.float32),
        grid=(n_pad // tm,),
        in_specs=[
            pl.BlockSpec((tm, fin), lambda i: (i, 0)),
            pl.BlockSpec((tm, k, fin), lambda i: (i, 0, 0)),
            pl.BlockSpec((tm, k), lambda i: (i, 0)),
            *weight_specs,
        ],
        out_specs=pl.BlockSpec((tm, k), lambda i: (i, 0)),
        compiler_params=_compiler_params(),
    )(feat_bf, sub, dists, *weights)
    return out[:n]


@jax.jit
def pgnn_forward(params, x, dists_max, dists_argmax):
    # linear_pre (Pallas); its output is needed host-of-kernel for the gather
    x = linear(x, params["pre_w"], params["pre_b"])
    # conv_first: only the structure output is used downstream
    x = pgnn_layer_struct(x, dists_max, dists_argmax, params["conv_first"])
    # dropout -> identity (inference)
    # conv_out: only the position output is used; L2 normalize fused in-kernel
    return pgnn_layer_pos_normalized(x, dists_max, dists_argmax, params["conv_out"])


# ---------------------------------------------------------------------------
# Parameter construction (xavier_uniform with relu gain, zero biases)
# ---------------------------------------------------------------------------

def xavier_uniform_T(key, in_dim, out_dim, gain):
    """PyTorch xavier_uniform on a [out, in] weight, returned transposed [in, out]."""
    bound = gain * np.sqrt(6.0 / (in_dim + out_dim))
    w = jax.random.uniform(key, (out_dim, in_dim), jnp.float32, -bound, bound)
    return w.T


def make_pgnn_layer_params(key, input_dim, output_dim, gain):
    k1, k2, k3, k4 = jax.random.split(key, 4)
    return {
        # dist_compute = Nonlinear(1, output_dim, 1)
        "w1d": xavier_uniform_T(k1, 1, output_dim, gain),
        "b1d": jnp.zeros((1, output_dim), jnp.float32),
        "w2d": xavier_uniform_T(k2, output_dim, 1, gain),
        "b2d": jnp.zeros((1, 1), jnp.float32),
        # linear_hidden: Linear(input_dim * 2, output_dim)
        "wh": xavier_uniform_T(k3, input_dim * 2, output_dim, gain),
        "bh": jnp.zeros((1, output_dim), jnp.float32),
        # linear_out_position: Linear(output_dim, 1)
        "wp": xavier_uniform_T(k4, output_dim, 1, gain),
        "bp": jnp.zeros((1, 1), jnp.float32),
    }


def make_pgnn_params(key, input_dim, feature_dim, hidden_dim, output_dim):
    gain = float(np.sqrt(2.0))  # nn.init.calculate_gain('relu')
    k1, k2, k3 = jax.random.split(key, 3)
    return {
        "pre_w": xavier_uniform_T(k1, input_dim, feature_dim, gain),
        "pre_b": jnp.zeros((1, feature_dim), jnp.float32),
        "conv_first": make_pgnn_layer_params(k2, feature_dim, hidden_dim, gain),
        "conv_out": make_pgnn_layer_params(k3, hidden_dim, output_dim, gain),
    }


# ---------------------------------------------------------------------------
# Pure-JAX reference (mirrors the PyTorch forward, for verification)
# ---------------------------------------------------------------------------

def ref_layer(feature, dists_max, dists_argmax, p):
    d = dists_max[..., None]
    h_d = jnp.maximum(d @ p["w1d"] + p["b1d"], 0.0)
    d_new = (h_d @ p["w2d"] + p["b2d"])[..., 0]                   # [N, K]
    subset = feature[dists_argmax.reshape(-1), :].reshape(
        dists_argmax.shape[0], dists_argmax.shape[1], feature.shape[1]
    )
    messages = subset * d_new[..., None]
    self_feat = jnp.broadcast_to(
        feature[:, None, :], (feature.shape[0], dists_max.shape[1], feature.shape[1])
    )
    messages = jnp.concatenate([messages, self_feat], axis=-1)
    messages = jnp.maximum(messages @ p["wh"] + p["bh"], 0.0)
    out_pos = (messages @ p["wp"] + p["bp"])[..., 0]
    out_struct = jnp.mean(messages, axis=1)
    return out_pos, out_struct


def ref_forward(params, x, dists_max, dists_argmax):
    x = x @ params["pre_w"] + params["pre_b"]
    _, x = ref_layer(x, dists_max, dists_argmax, params["conv_first"])
    x_position, _ = ref_layer(x, dists_max, dists_argmax, params["conv_out"])
    norm = jnp.sqrt(jnp.sum(x_position * x_position, axis=-1, keepdims=True))
    return x_position / jnp.maximum(norm, 1e-12)


# ---------------------------------------------------------------------------
# Main
# ---------------------------------------------------------------------------

if __name__ == "__main__":
    N, K = 16, 8              # nodes, anchor sets
    input_dim, feature_dim = 8, 16
    hidden_dim, output_dim = 32, 16

    key = jax.random.PRNGKey(0)
    kp, kx, kd, ki = jax.random.split(key, 4)

    params = make_pgnn_params(kp, input_dim, feature_dim, hidden_dim, output_dim)

    x = jax.random.normal(kx, (N, input_dim), jnp.float32)
    dists_max = jax.random.uniform(kd, (N, K), jnp.float32)
    dists_argmax = jax.random.randint(ki, (N, K), 0, N, jnp.int32)

    out = pgnn_forward(params, x, dists_max, dists_argmax)
    out = jax.block_until_ready(out)

    ref = ref_forward(params, x, dists_max, dists_argmax)
    # Tolerance widened slightly (2e-2) because MXU operands are bf16 with f32
    # accumulation; the f32 reference mirrors PyTorch exactly.
    if not np.allclose(np.asarray(out), np.asarray(ref), rtol=2e-2, atol=2e-2):
        raise AssertionError("Pallas PGNN output mismatch vs JAX reference")

    print("KERNEL_OK")
</pallas_src>

<mosaic_0001>
module attributes {stable_mosaic.version = 11 : i64} {
  func.func @linear_kernel(%arg0: i32, %arg1: memref<16x8xf32, #tpu.memory_space<vmem>>, %arg2: memref<8x16xf32, #tpu.memory_space<vmem>>, %arg3: memref<1x16xf32, #tpu.memory_space<vmem>>, %arg4: memref<16x16xf32, #tpu.memory_space<vmem>>) attributes {dimension_semantics = [#tpu.dimension_semantics<parallel>], iteration_bounds = array<i64: 1>, scalar_prefetch = 0 : i64, scratch_operands = 0 : i64, tpu.core_type = #tpu.core_type<tc>, window_params = [{transform_indices = @transform_0, window_bounds = array<i64: 16, 8>}, {pipeline_mode = #tpu.pipeline_mode<synchronous>, transform_indices = @transform_1, window_bounds = array<i64: 8, 16>}, {pipeline_mode = #tpu.pipeline_mode<synchronous>, transform_indices = @transform_2, window_bounds = array<i64: 1, 16>}, {transform_indices = @transform_3, window_bounds = array<i64: 16, 16>}]} {
    %c0 = arith.constant 0 : index
    %c0_0 = arith.constant 0 : index
    %0 = vector.load %arg1[%c0, %c0_0] : memref<16x8xf32, #tpu.memory_space<vmem>>, vector<16x8xf32>
    %c0_1 = arith.constant 0 : index
    %c0_2 = arith.constant 0 : index
    %1 = vector.load %arg2[%c0_1, %c0_2] : memref<8x16xf32, #tpu.memory_space<vmem>>, vector<8x16xf32>
    %cst = arith.constant dense<0.000000e+00> : vector<16x16xf32>
    %2 = tpu.matmul %0, %1, %cst {dimension_numbers = #tpu.dot_dimension_numbers<[1], [0], [0], [1], [0, 0, 1, 1], [], []>} : vector<16x8xf32>, vector<8x16xf32>, vector<16x16xf32> -> vector<16x16xf32>
    %c0_3 = arith.constant 0 : index
    %c0_4 = arith.constant 0 : index
    %3 = vector.load %arg3[%c0_3, %c0_4] : memref<1x16xf32, #tpu.memory_space<vmem>>, vector<1x16xf32>
    %4 = vector.broadcast %3 : vector<1x16xf32> to vector<16x16xf32>
    %5 = arith.addf %2, %4 : vector<16x16xf32>
    %c0_5 = arith.constant 0 : index
    %c0_6 = arith.constant 0 : index
    %6 = vector.load %arg4[%c0_5, %c0_6] : memref<16x16xf32, #tpu.memory_space<vmem>>, vector<16x16xf32>
    tpu.vector_store %arg4[%c0_5, %c0_6], %5 {strides = array<i32>} : memref<16x16xf32, #tpu.memory_space<vmem>>, vector<16x16xf32>,
    return
  }
  func.func @transform_0(%arg0: i32) -> (i32, i32) {
    %c0_i32 = arith.constant 0 : i32
    %c0_i32_0 = arith.constant 0 : i32
    return %arg0, %c0_i32 : i32, i32
  }
  func.func @transform_1(%arg0: i32) -> (i32, i32) {
    %c0_i32 = arith.constant 0 : i32
    %c0_i32_0 = arith.constant 0 : i32
    %c0_i32_1 = arith.constant 0 : i32
    return %c0_i32, %c0_i32_0 : i32, i32
  }
  func.func @transform_2(%arg0: i32) -> (i32, i32) {
    %c0_i32 = arith.constant 0 : i32
    %c0_i32_0 = arith.constant 0 : i32
    %c0_i32_1 = arith.constant 0 : i32
    return %c0_i32, %c0_i32_0 : i32, i32
  }
  func.func @transform_3(%arg0: i32) -> (i32, i32) {
    %c0_i32 = arith.constant 0 : i32
    %c0_i32_0 = arith.constant 0 : i32
    return %arg0, %c0_i32 : i32, i32
  }
}

module attributes {stable_mosaic.version = 11 : i64} {
  func.func @pgnn_struct_kernel(%arg0: i32, %arg1: memref<16x16xbf16, #tpu.memory_space<vmem>>, %arg2: memref<16x8x16xbf16, #tpu.memory_space<vmem>>, %arg3: memref<16x8xf32, #tpu.memory_space<vmem>>, %arg4: memref<1x32xf32, #tpu.memory_space<vmem>>, %arg5: memref<1x32xf32, #tpu.memory_space<vmem>>, %arg6: memref<1x32xf32, #tpu.memory_space<vmem>>, %arg7: memref<1x1xf32, #tpu.memory_space<vmem>>, %arg8: memref<16x32xbf16, #tpu.memory_space<vmem>>, %arg9: memref<16x32xbf16, #tpu.memory_space<vmem>>, %arg10: memref<1x32xf32, #tpu.memory_space<vmem>>, %arg11: memref<16x32xf32, #tpu.memory_space<vmem>>) attributes {dimension_semantics = [#tpu.dimension_semantics<parallel>], iteration_bounds = array<i64: 1>, scalar_prefetch = 0 : i64, scratch_operands = 0 : i64, tpu.core_type = #tpu.core_type<tc>, window_params = [{transform_indices = @transform_0, window_bounds = array<i64: 16, 16>}, {transform_indices = @transform_1, window_bounds = array<i64: 16, 8, 16>}, {transform_indices = @transform_2, window_bounds = array<i64: 16, 8>}, {pipeline_mode = #tpu.pipeline_mode<synchronous>, transform_indices = @transform_3, window_bounds = array<i64: 1, 32>}, {pipeline_mode = #tpu.pipeline_mode<synchronous>, transform_indices = @transform_4, window_bounds = array<i64: 1, 32>}, {pipeline_mode = #tpu.pipeline_mode<synchronous>, transform_indices = @transform_5, window_bounds = array<i64: 1, 32>}, {pipeline_mode = #tpu.pipeline_mode<synchronous>, transform_indices = @transform_6, window_bounds = array<i64: 1, 1>}, {pipeline_mode = #tpu.pipeline_mode<synchronous>, transform_indices = @transform_7, window_bounds = array<i64: 16, 32>}, {pipeline_mode = #tpu.pipeline_mode<synchronous>, transform_indices = @transform_8, window_bounds = array<i64: 16, 32>}, {pipeline_mode = #tpu.pipeline_mode<synchronous>, transform_indices = @transform_9, window_bounds = array<i64: 1, 32>}, {transform_indices = @transform_10, window_bounds = array<i64: 16, 32>}]} {
    %c0 = arith.constant 0 : index
    %c0_0 = arith.constant 0 : index
    %0 = vector.load %arg1[%c0, %c0_0] : memref<16x16xbf16, #tpu.memory_space<vmem>>, vector<16x16xbf16>
    %c0_1 = arith.constant 0 : index
    %c0_2 = arith.constant 0 : index
    %1 = vector.load %arg9[%c0_1, %c0_2] : memref<16x32xbf16, #tpu.memory_space<vmem>>, vector<16x32xbf16>
    %cst = arith.constant dense<0.000000e+00> : vector<16x32xf32>
    %2 = tpu.matmul %0, %1, %cst {dimension_numbers = #tpu.dot_dimension_numbers<[1], [0], [0], [1], [0, 0, 1, 1], [], []>} : vector<16x16xbf16>, vector<16x32xbf16>, vector<16x32xf32> -> vector<16x32xf32>
    %c0_3 = arith.constant 0 : index
    %c0_4 = arith.constant 0 : index
    %3 = vector.load %arg10[%c0_3, %c0_4] : memref<1x32xf32, #tpu.memory_space<vmem>>, vector<1x32xf32>
    %4 = vector.broadcast %3 : vector<1x32xf32> to vector<16x32xf32>
    %5 = arith.addf %2, %4 : vector<16x32xf32>
    %c0_5 = arith.constant 0 : index
    %c0_6 = arith.constant 0 : index
    %6 = vector.load %arg3[%c0_5, %c0_6] : memref<16x8xf32, #tpu.memory_space<vmem>>, vector<16x8xf32>
    %7 = vector.shape_cast %6 : vector<16x8xf32> to vector<16x8x1xf32>
    %c0_7 = arith.constant 0 : index
    %c0_8 = arith.constant 0 : index
    %8 = vector.load %arg4[%c0_7, %c0_8] : memref<1x32xf32, #tpu.memory_space<vmem>>, vector<1x32xf32>
    %9 = vector.shape_cast %8 : vector<1x32xf32> to vector<1x1x32xf32>
    %10 = vector.broadcast %7 : vector<16x8x1xf32> to vector<16x8x32xf32>
    %11 = vector.broadcast %9 : vector<1x1x32xf32> to vector<16x8x32xf32>
    %12 = arith.mulf %10, %11 : vector<16x8x32xf32>
    %c0_9 = arith.constant 0 : index
    %c0_10 = arith.constant 0 : index
    %13 = vector.load %arg5[%c0_9, %c0_10] : memref<1x32xf32, #tpu.memory_space<vmem>>, vector<1x32xf32>
    %14 = vector.shape_cast %13 : vector<1x32xf32> to vector<1x1x32xf32>
    %15 = vector.broadcast %14 : vector<1x1x32xf32> to vector<16x8x32xf32>
    %16 = arith.addf %12, %15 : vector<16x8x32xf32>
    %cst_11 = arith.constant 0.000000e+00 : f32
    %17 = vector.broadcast %cst_11 : f32 to vector<16x8x32xf32>
    %18 = arith.maximumf %16, %17 : vector<16x8x32xf32>
    %c0_12 = arith.constant 0 : index
    %c0_13 = arith.constant 0 : index
    %19 = vector.load %arg6[%c0_12, %c0_13] : memref<1x32xf32, #tpu.memory_space<vmem>>, vector<1x32xf32>
    %20 = vector.shape_cast %19 : vector<1x32xf32> to vector<1x1x32xf32>
    %21 = vector.broadcast %20 : vector<1x1x32xf32> to vector<16x8x32xf32>
    %22 = arith.mulf %18, %21 : vector<16x8x32xf32>
    %cst_14 = arith.constant dense<0.000000e+00> : vector<16x8xf32>
    %23 = vector.multi_reduction <add>, %22, %cst_14 [2] : vector<16x8x32xf32> to vector<16x8xf32>
    %c0_15 = arith.constant 0 : index
    %c0_16 = arith.constant 0 : index
    %24 = vector.load %arg7[%c0_15, %c0_16] : memref<1x1xf32, #tpu.memory_space<vmem>>, vector<1x1xf32>
    %25 = vector.broadcast %24 : vector<1x1xf32> to vector<16x8xf32>
    %26 = arith.addf %23, %25 : vector<16x8xf32>
    %c0_17 = arith.constant 0 : index
    %c0_18 = arith.constant 0 : index
    %c0_19 = arith.constant 0 : index
    %27 = vector.load %arg2[%c0_17, %c0_18, %c0_19] : memref<16x8x16xbf16, #tpu.memory_space<vmem>>, vector<16x8x16xbf16>
    %28 = arith.extf %27 : vector<16x8x16xbf16> to vector<16x8x16xf32>
    %29 = vector.shape_cast %26 : vector<16x8xf32> to vector<16x8x1xf32>
    %30 = vector.broadcast %29 : vector<16x8x1xf32> to vector<16x8x16xf32>
    %31 = arith.mulf %28, %30 : vector<16x8x16xf32>
    %32 = vector.shape_cast %31 : vector<16x8x16xf32> to vector<128x16xf32>
    %33 = arith.truncf %32 : vector<128x16xf32> to vector<128x16xbf16>
    %c0_20 = arith.constant 0 : index
    %c0_21 = arith.constant 0 : index
    %34 = vector.load %arg8[%c0_20, %c0_21] : memref<16x32xbf16, #tpu.memory_space<vmem>>, vector<16x32xbf16>
    %cst_22 = arith.constant dense<0.000000e+00> : vector<128x32xf32>
    %35 = tpu.matmul %33, %34, %cst_22 {dimension_numbers = #tpu.dot_dimension_numbers<[1], [0], [0], [1], [0, 0, 1, 1], [], []>} : vector<128x16xbf16>, vector<16x32xbf16>, vector<128x32xf32> -> vector<128x32xf32>
    %36 = vector.shape_cast %35 : vector<128x32xf32> to vector<16x8x32xf32>
    %37 = vector.shape_cast %5 : vector<16x32xf32> to vector<16x1x32xf32>
    %38 = vector.broadcast %37 : vector<16x1x32xf32> to vector<16x8x32xf32>
    %39 = arith.addf %36, %38 : vector<16x8x32xf32>
    %cst_23 = arith.constant 0.000000e+00 : f32
    %40 = vector.broadcast %cst_23 : f32 to vector<16x8x32xf32>
    %41 = arith.maximumf %39, %40 : vector<16x8x32xf32>
    %cst_24 = arith.constant dense<0.000000e+00> : vector<16x32xf32>
    %42 = vector.multi_reduction <add>, %41, %cst_24 [1] : vector<16x8x32xf32> to vector<16x32xf32>
    %cst_25 = arith.constant 1.250000e-01 : f32
    %43 = vector.broadcast %cst_25 : f32 to vector<16x32xf32>
    %44 = arith.mulf %42, %43 : vector<16x32xf32>
    %c0_26 = arith.constant 0 : index
    %c0_27 = arith.constant 0 : index
    %45 = vector.load %arg11[%c0_26, %c0_27] : memref<16x32xf32, #tpu.memory_space<vmem>>, vector<16x32xf32>
    tpu.vector_store %arg11[%c0_26, %c0_27], %44 {strides = array<i32>} : memref<16x32xf32, #tpu.memory_space<vmem>>, vector<16x32xf32>,
    return
  }
  func.func @transform_0(%arg0: i32) -> (i32, i32) {
    %c0_i32 = arith.constant 0 : i32
    %c0_i32_0 = arith.constant 0 : i32
    return %arg0, %c0_i32 : i32, i32
  }
  func.func @transform_1(%arg0: i32) -> (i32, i32, i32) {
    %c0_i32 = arith.constant 0 : i32
    %c0_i32_0 = arith.constant 0 : i32
    %c0_i32_1 = arith.constant 0 : i32
    return %arg0, %c0_i32, %c0_i32_0 : i32, i32, i32
  }
  func.func @transform_2(%arg0: i32) -> (i32, i32) {
    %c0_i32 = arith.constant 0 : i32
    %c0_i32_0 = arith.constant 0 : i32
    return %arg0, %c0_i32 : i32, i32
  }
  func.func @transform_3(%arg0: i32) -> (i32, i32) {
    %c0_i32 = arith.constant 0 : i32
    %c0_i32_0 = arith.constant 0 : i32
    %c0_i32_1 = arith.constant 0 : i32
    return %c0_i32, %c0_i32_0 : i32, i32
  }
  func.func @transform_4(%arg0: i32) -> (i32, i32) {
    %c0_i32 = arith.constant 0 : i32
    %c0_i32_0 = arith.constant 0 : i32
    %c0_i32_1 = arith.constant 0 : i32
    return %c0_i32, %c0_i32_0 : i32, i32
  }
  func.func @transform_5(%arg0: i32) -> (i32, i32) {
    %c0_i32 = arith.constant 0 : i32
    %c0_i32_0 = arith.constant 0 : i32
    %c0_i32_1 = arith.constant 0 : i32
    return %c0_i32, %c0_i32_0 : i32, i32
  }
  func.func @transform_6(%arg0: i32) -> (i32, i32) {
    %c0_i32 = arith.constant 0 : i32
    %c0_i32_0 = arith.constant 0 : i32
    %c0_i32_1 = arith.constant 0 : i32
    return %c0_i32, %c0_i32_0 : i32, i32
  }
  func.func @transform_7(%arg0: i32) -> (i32, i32) {
    %c0_i32 = arith.constant 0 : i32
    %c0_i32_0 = arith.constant 0 : i32
    %c0_i32_1 = arith.constant 0 : i32
    return %c0_i32, %c0_i32_0 : i32, i32
  }
  func.func @transform_8(%arg0: i32) -> (i32, i32) {
    %c0_i32 = arith.constant 0 : i32
    %c0_i32_0 = arith.constant 0 : i32
    %c0_i32_1 = arith.constant 0 : i32
    return %c0_i32, %c0_i32_0 : i32, i32
  }
  func.func @transform_9(%arg0: i32) -> (i32, i32) {
    %c0_i32 = arith.constant 0 : i32
    %c0_i32_0 = arith.constant 0 : i32
    %c0_i32_1 = arith.constant 0 : i32
    return %c0_i32, %c0_i32_0 : i32, i32
  }
  func.func @transform_10(%arg0: i32) -> (i32, i32) {
    %c0_i32 = arith.constant 0 : i32
    %c0_i32_0 = arith.constant 0 : i32
    return %arg0, %c0_i32 : i32, i32
  }
}

module attributes {stable_mosaic.version = 11 : i64} {
  func.func @pgnn_pos_kernel(%arg0: i32, %arg1: memref<16x32xbf16, #tpu.memory_space<vmem>>, %arg2: memref<16x8x32xbf16, #tpu.memory_space<vmem>>, %arg3: memref<16x8xf32, #tpu.memory_space<vmem>>, %arg4: memref<1x16xf32, #tpu.memory_space<vmem>>, %arg5: memref<1x16xf32, #tpu.memory_space<vmem>>, %arg6: memref<1x16xf32, #tpu.memory_space<vmem>>, %arg7: memref<1x1xf32, #tpu.memory_space<vmem>>, %arg8: memref<32x16xbf16, #tpu.memory_space<vmem>>, %arg9: memref<32x16xbf16, #tpu.memory_space<vmem>>, %arg10: memref<1x16xf32, #tpu.memory_space<vmem>>, %arg11: memref<1x16xf32, #tpu.memory_space<vmem>>, %arg12: memref<1x1xf32, #tpu.memory_space<vmem>>, %arg13: memref<16x8xf32, #tpu.memory_space<vmem>>) attributes {dimension_semantics = [#tpu.dimension_semantics<parallel>], iteration_bounds = array<i64: 1>, scalar_prefetch = 0 : i64, scratch_operands = 0 : i64, tpu.core_type = #tpu.core_type<tc>, window_params = [{transform_indices = @transform_0, window_bounds = array<i64: 16, 32>}, {transform_indices = @transform_1, window_bounds = array<i64: 16, 8, 32>}, {transform_indices = @transform_2, window_bounds = array<i64: 16, 8>}, {pipeline_mode = #tpu.pipeline_mode<synchronous>, transform_indices = @transform_3, window_bounds = array<i64: 1, 16>}, {pipeline_mode = #tpu.pipeline_mode<synchronous>, transform_indices = @transform_4, window_bounds = array<i64: 1, 16>}, {pipeline_mode = #tpu.pipeline_mode<synchronous>, transform_indices = @transform_5, window_bounds = array<i64: 1, 16>}, {pipeline_mode = #tpu.pipeline_mode<synchronous>, transform_indices = @transform_6, window_bounds = array<i64: 1, 1>}, {pipeline_mode = #tpu.pipeline_mode<synchronous>, transform_indices = @transform_7, window_bounds = array<i64: 32, 16>}, {pipeline_mode = #tpu.pipeline_mode<synchronous>, transform_indices = @transform_8, window_bounds = array<i64: 32, 16>}, {pipeline_mode = #tpu.pipeline_mode<synchronous>, transform_indices = @transform_9, window_bounds = array<i64: 1, 16>}, {pipeline_mode = #tpu.pipeline_mode<synchronous>, transform_indices = @transform_10, window_bounds = array<i64: 1, 16>}, {pipeline_mode = #tpu.pipeline_mode<synchronous>, transform_indices = @transform_11, window_bounds = array<i64: 1, 1>}, {transform_indices = @transform_12, window_bounds = array<i64: 16, 8>}]} {
    %c0 = arith.constant 0 : index
    %c0_0 = arith.constant 0 : index
    %0 = vector.load %arg1[%c0, %c0_0] : memref<16x32xbf16, #tpu.memory_space<vmem>>, vector<16x32xbf16>
    %c0_1 = arith.constant 0 : index
    %c0_2 = arith.constant 0 : index
    %1 = vector.load %arg9[%c0_1, %c0_2] : memref<32x16xbf16, #tpu.memory_space<vmem>>, vector<32x16xbf16>
    %cst = arith.constant dense<0.000000e+00> : vector<16x16xf32>
    %2 = tpu.matmul %0, %1, %cst {dimension_numbers = #tpu.dot_dimension_numbers<[1], [0], [0], [1], [0, 0, 1, 1], [], []>} : vector<16x32xbf16>, vector<32x16xbf16>, vector<16x16xf32> -> vector<16x16xf32>
    %c0_3 = arith.constant 0 : index
    %c0_4 = arith.constant 0 : index
    %3 = vector.load %arg10[%c0_3, %c0_4] : memref<1x16xf32, #tpu.memory_space<vmem>>, vector<1x16xf32>
    %4 = vector.broadcast %3 : vector<1x16xf32> to vector<16x16xf32>
    %5 = arith.addf %2, %4 : vector<16x16xf32>
    %c0_5 = arith.constant 0 : index
    %c0_6 = arith.constant 0 : index
    %6 = vector.load %arg3[%c0_5, %c0_6] : memref<16x8xf32, #tpu.memory_space<vmem>>, vector<16x8xf32>
    %7 = vector.shape_cast %6 : vector<16x8xf32> to vector<16x8x1xf32>
    %c0_7 = arith.constant 0 : index
    %c0_8 = arith.constant 0 : index
    %8 = vector.load %arg4[%c0_7, %c0_8] : memref<1x16xf32, #tpu.memory_space<vmem>>, vector<1x16xf32>
    %9 = vector.shape_cast %8 : vector<1x16xf32> to vector<1x1x16xf32>
    %10 = vector.broadcast %7 : vector<16x8x1xf32> to vector<16x8x16xf32>
    %11 = vector.broadcast %9 : vector<1x1x16xf32> to vector<16x8x16xf32>
    %12 = arith.mulf %10, %11 : vector<16x8x16xf32>
    %c0_9 = arith.constant 0 : index
    %c0_10 = arith.constant 0 : index
    %13 = vector.load %arg5[%c0_9, %c0_10] : memref<1x16xf32, #tpu.memory_space<vmem>>, vector<1x16xf32>
    %14 = vector.shape_cast %13 : vector<1x16xf32> to vector<1x1x16xf32>
    %15 = vector.broadcast %14 : vector<1x1x16xf32> to vector<16x8x16xf32>
    %16 = arith.addf %12, %15 : vector<16x8x16xf32>
    %cst_11 = arith.constant 0.000000e+00 : f32
    %17 = vector.broadcast %cst_11 : f32 to vector<16x8x16xf32>
    %18 = arith.maximumf %16, %17 : vector<16x8x16xf32>
    %c0_12 = arith.constant 0 : index
    %c0_13 = arith.constant 0 : index
    %19 = vector.load %arg6[%c0_12, %c0_13] : memref<1x16xf32, #tpu.memory_space<vmem>>, vector<1x16xf32>
    %20 = vector.shape_cast %19 : vector<1x16xf32> to vector<1x1x16xf32>
    %21 = vector.broadcast %20 : vector<1x1x16xf32> to vector<16x8x16xf32>
    %22 = arith.mulf %18, %21 : vector<16x8x16xf32>
    %cst_14 = arith.constant dense<0.000000e+00> : vector<16x8xf32>
    %23 = vector.multi_reduction <add>, %22, %cst_14 [2] : vector<16x8x16xf32> to vector<16x8xf32>
    %c0_15 = arith.constant 0 : index
    %c0_16 = arith.constant 0 : index
    %24 = vector.load %arg7[%c0_15, %c0_16] : memref<1x1xf32, #tpu.memory_space<vmem>>, vector<1x1xf32>
    %25 = vector.broadcast %24 : vector<1x1xf32> to vector<16x8xf32>
    %26 = arith.addf %23, %25 : vector<16x8xf32>
    %c0_17 = arith.constant 0 : index
    %c0_18 = arith.constant 0 : index
    %c0_19 = arith.constant 0 : index
    %27 = vector.load %arg2[%c0_17, %c0_18, %c0_19] : memref<16x8x32xbf16, #tpu.memory_space<vmem>>, vector<16x8x32xbf16>
    %28 = arith.extf %27 : vector<16x8x32xbf16> to vector<16x8x32xf32>
    %29 = vector.shape_cast %26 : vector<16x8xf32> to vector<16x8x1xf32>
    %30 = vector.broadcast %29 : vector<16x8x1xf32> to vector<16x8x32xf32>
    %31 = arith.mulf %28, %30 : vector<16x8x32xf32>
    %32 = vector.shape_cast %31 : vector<16x8x32xf32> to vector<128x32xf32>
    %33 = arith.truncf %32 : vector<128x32xf32> to vector<128x32xbf16>
    %c0_20 = arith.constant 0 : index
    %c0_21 = arith.constant 0 : index
    %34 = vector.load %arg8[%c0_20, %c0_21] : memref<32x16xbf16, #tpu.memory_space<vmem>>, vector<32x16xbf16>
    %cst_22 = arith.constant dense<0.000000e+00> : vector<128x16xf32>
    %35 = tpu.matmul %33, %34, %cst_22 {dimension_numbers = #tpu.dot_dimension_numbers<[1], [0], [0], [1], [0, 0, 1, 1], [], []>} : vector<128x32xbf16>, vector<32x16xbf16>, vector<128x16xf32> -> vector<128x16xf32>
    %36 = vector.shape_cast %35 : vector<128x16xf32> to vector<16x8x16xf32>
    %37 = vector.shape_cast %5 : vector<16x16xf32> to vector<16x1x16xf32>
    %38 = vector.broadcast %37 : vector<16x1x16xf32> to vector<16x8x16xf32>
    %39 = arith.addf %36, %38 : vector<16x8x16xf32>
    %cst_23 = arith.constant 0.000000e+00 : f32
    %40 = vector.broadcast %cst_23 : f32 to vector<16x8x16xf32>
    %41 = arith.maximumf %39, %40 : vector<16x8x16xf32>
    %c0_24 = arith.constant 0 : index
    %c0_25 = arith.constant 0 : index
    %42 = vector.load %arg11[%c0_24, %c0_25] : memref<1x16xf32, #tpu.memory_space<vmem>>, vector<1x16xf32>
    %43 = vector.shape_cast %42 : vector<1x16xf32> to vector<1x1x16xf32>
    %44 = vector.broadcast %43 : vector<1x1x16xf32> to vector<16x8x16xf32>
    %45 = arith.mulf %41, %44 : vector<16x8x16xf32>
    %cst_26 = arith.constant dense<0.000000e+00> : vector<16x8xf32>
    %46 = vector.multi_reduction <add>, %45, %cst_26 [2] : vector<16x8x16xf32> to vector<16x8xf32>
    %c0_27 = arith.constant 0 : index
    %c0_28 = arith.constant 0 : index
    %47 = vector.load %arg12[%c0_27, %c0_28] : memref<1x1xf32, #tpu.memory_space<vmem>>, vector<1x1xf32>
    %48 = vector.broadcast %47 : vector<1x1xf32> to vector<16x8xf32>
    %49 = arith.addf %46, %48 : vector<16x8xf32>
    %50 = arith.mulf %49, %49 : vector<16x8xf32>
    %cst_29 = arith.constant dense<0.000000e+00> : vector<16xf32>
    %51 = vector.multi_reduction <add>, %50, %cst_29 [1] : vector<16x8xf32> to vector<16xf32>
    %52 = vector.shape_cast %51 : vector<16xf32> to vector<16x1xf32>
    %53 = math.sqrt %52 : vector<16x1xf32>
    %cst_30 = arith.constant 9.99999996E-13 : f32
    %54 = vector.broadcast %cst_30 : f32 to vector<16x1xf32>
    %55 = arith.maximumf %53, %54 : vector<16x1xf32>
    %56 = vector.broadcast %55 : vector<16x1xf32> to vector<16x8xf32>
    %57 = arith.divf %49, %56 : vector<16x8xf32>
    %c0_31 = arith.constant 0 : index
    %c0_32 = arith.constant 0 : index
    %58 = vector.load %arg13[%c0_31, %c0_32] : memref<16x8xf32, #tpu.memory_space<vmem>>, vector<16x8xf32>
    tpu.vector_store %arg13[%c0_31, %c0_32], %57 {strides = array<i32>} : memref<16x8xf32, #tpu.memory_space<vmem>>, vector<16x8xf32>,
    return
  }
  func.func @transform_0(%arg0: i32) -> (i32, i32) {
    %c0_i32 = arith.constant 0 : i32
    %c0_i32_0 = arith.constant 0 : i32
    return %arg0, %c0_i32 : i32, i32
  }
  func.func @transform_1(%arg0: i32) -> (i32, i32, i32) {
    %c0_i32 = arith.constant 0 : i32
    %c0_i32_0 = arith.constant 0 : i32
    %c0_i32_1 = arith.constant 0 : i32
    return %arg0, %c0_i32, %c0_i32_0 : i32, i32, i32
  }
  func.func @transform_2(%arg0: i32) -> (i32, i32) {
    %c0_i32 = arith.constant 0 : i32
    %c0_i32_0 = arith.constant 0 : i32
    return %arg0, %c0_i32 : i32, i32
  }
  func.func @transform_3(%arg0: i32) -> (i32, i32) {
    %c0_i32 = arith.constant 0 : i32
    %c0_i32_0 = arith.constant 0 : i32
    %c0_i32_1 = arith.constant 0 : i32
    return %c0_i32, %c0_i32_0 : i32, i32
  }
  func.func @transform_4(%arg0: i32) -> (i32, i32) {
    %c0_i32 = arith.constant 0 : i32
    %c0_i32_0 = arith.constant 0 : i32
    %c0_i32_1 = arith.constant 0 : i32
    return %c0_i32, %c0_i32_0 : i32, i32
  }
  func.func @transform_5(%arg0: i32) -> (i32, i32) {
    %c0_i32 = arith.constant 0 : i32
    %c0_i32_0 = arith.constant 0 : i32
    %c0_i32_1 = arith.constant 0 : i32
    return %c0_i32, %c0_i32_0 : i32, i32
  }
  func.func @transform_6(%arg0: i32) -> (i32, i32) {
    %c0_i32 = arith.constant 0 : i32
    %c0_i32_0 = arith.constant 0 : i32
    %c0_i32_1 = arith.constant 0 : i32
    return %c0_i32, %c0_i32_0 : i32, i32
  }
  func.func @transform_7(%arg0: i32) -> (i32, i32) {
    %c0_i32 = arith.constant 0 : i32
    %c0_i32_0 = arith.constant 0 : i32
    %c0_i32_1 = arith.constant 0 : i32
    return %c0_i32, %c0_i32_0 : i32, i32
  }
  func.func @transform_8(%arg0: i32) -> (i32, i32) {
    %c0_i32 = arith.constant 0 : i32
    %c0_i32_0 = arith.constant 0 : i32
    %c0_i32_1 = arith.constant 0 : i32
    return %c0_i32, %c0_i32_0 : i32, i32
  }
  func.func @transform_9(%arg0: i32) -> (i32, i32) {
    %c0_i32 = arith.constant 0 : i32
    %c0_i32_0 = arith.constant 0 : i32
    %c0_i32_1 = arith.constant 0 : i32
    return %c0_i32, %c0_i32_0 : i32, i32
  }
  func.func @transform_10(%arg0: i32) -> (i32, i32) {
    %c0_i32 = arith.constant 0 : i32
    %c0_i32_0 = arith.constant 0 : i32
    %c0_i32_1 = arith.constant 0 : i32
    return %c0_i32, %c0_i32_0 : i32, i32
  }
  func.func @transform_11(%arg0: i32) -> (i32, i32) {
    %c0_i32 = arith.constant 0 : i32
    %c0_i32_0 = arith.constant 0 : i32
    %c0_i32_1 = arith.constant 0 : i32
    return %c0_i32, %c0_i32_0 : i32, i32
  }
  func.func @transform_12(%arg0: i32) -> (i32, i32) {
    %c0_i32 = arith.constant 0 : i32
    %c0_i32_0 = arith.constant 0 : i32
    return %arg0, %c0_i32 : i32, i32
  }
}

</mosaic_0001>

<bundles_post_ra>
// kernel: pgnn_forward.3
= control target key start
LH: loop header
LB: loop body
LE: loop exit
PB: predicated region body
PF: predicated region fallthrough
CT: control target
= control target key end

     0   :  { %vm24_vm0 = vcmask 64512   ;;  %vm106_vm1 = vcmask 130048   ;;  %s162_s1 = inlined_call_operand.vmem [shape: f32[8,16], index: 1, kind: input, shape index: {}]   ;;  %s163_s0 = inlined_call_operand.vmem [shape: f32[16,8], index: 0, kind: input, shape index: {}]   ;;  %s164_s2 = inlined_call_operand.vmem [shape: f32[1,16], index: 2, kind: input, shape index: {}]   ;;  %s165_s3 = inlined_call_operand.vmem [shape: f32[16,16], index: 3, kind: output, shape index: {}]  }
   0x1   :  { %v16_v0 = vld [vmem:[%s162_s1] sm:$0xff]  ;;  %v15_v2 = vld [vmem:[%s163_s0 + $0x8] sm:$0xff] }
   0x2   :  { %v14_v1 = vld [vmem:[%s163_s0] sm:$0xff]  ;;  %119 = vmatprep.subr.mxu0 %v16_v0 }
   0x3   :  { %121 = vmatprep.mubr.msk.f32.mxu0 %vm24_vm0, %v14_v1  ;;  %120 = vmatpush3.msra.mxu0 %v16_v0  ;;  %v113_v3 = vld [vmem:[%s164_s2] ss:$0 sm:$0xff] }
   0x4   :  { %122 = vmatmul.mubr.msk.f32.vlgmr.msra.gmra.mrb[0].mxu0 %vm24_vm0, %v15_v2 }
  0xd7   :  { %v123_v4 = vpop.f32.mrb[0].mxu0 }
  0xd8   :  { %v103_v5 = vadd.f32 %v123_v4, %v113_v3  ;;  %v97_v6 = vpop.f32.mrb[1].mxu0 }
  0xd9   :  { %v98_v7 = vadd.f32 %v113_v3, %v97_v6 }
  0xda   :  { %108 = vst.msk [vmem:[%s165_s3 + $0x8] sm:$0xff] %vm106_vm1, %v103_v5 }
  0xdb   :  { %107 = vst.msk [vmem:[%s165_s3] sm:$0xff] %vm106_vm1, %v98_v7 }

// kernel: pgnn_forward.4
= control target key start
LH: loop header
LB: loop body
LE: loop exit
PB: predicated region body
PF: predicated region fallthrough
CT: control target
= control target key end

     0   :  { %v107_v0 = vlaneseq  ;;  %v1051_v23 = vmov 0   ;;  %v1052_v30 = vmov 0.0   ;;  %vm304_vm0 = vcmask 261120   ;;  %s1390_s2 = inlined_call_operand.vmem [shape: f32[16,8], index: 2, kind: input, shape index: {}]   ;;  %s1391_s6 = inlined_call_operand.<no memory space> [shape: f32[1,1], index: 6, kind: input, shape index: {}]   ;;  %s1392_s3 = inlined_call_operand.vmem [shape: f32[1,32], index: 3, kind: input, shape index: {}]   ;;  %s1393_s4 = inlined_call_operand.vmem [shape: f32[1,32], index: 4, kind: input, shape index: {}]   ;;  %s1394_s5 = inlined_call_operand.vmem [shape: f32[1,32], index: 5, kind: input, shape index: {}]   ;;  %s1395_s8 = inlined_call_operand.vmem [shape: bf16[16,32], index: 8, kind: input, shape index: {}]   ;;  %s1396_s0 = inlined_call_operand.vmem [shape: bf16[16,16], index: 0, kind: input, shape index: {}]   ;;  %s1397_s7 = inlined_call_operand.vmem [shape: bf16[16,32], index: 7, kind: input, shape index: {}]   ;;  %s1398_s1 = inlined_call_operand.vmem [shape: bf16[16,8,16], index: 1, kind: input, shape index: {}]   ;;  %s1399_s9 = inlined_call_operand.vmem [shape: f32[1,32], index: 9, kind: input, shape index: {}]   ;;  %s1400_s10 = inlined_call_operand.vmem [shape: f32[16,32], index: 10, kind: output, shape index: {}]  }
   0x1   :  { %v105_v2 = vld [vmem:[%s1390_s2] sm:$0xff]  ;;  %v106_v13 = vld [vmem:[%s1390_s2 + $0x8] sm:$0xff]  ;;  %v15_v20 = vstv %s1391_s6  ;;  %1046 = vset.pattern.permute.xlu1 %v1051_v23  ;;  %1047 = vset.pattern.permute.xlu0 %v1051_v23  ;;  %vm1053_vm1 = vmmov 0   ;;  %vm60_vm2 = vcmask 130048   ;;  %vm920_vm3 = vcmask 1041409  }
   0x2   :  { %v1110_v1 = vshrl.u32 %v107_v0, 7  ;;  %16 = vst [vmem:[#allocation2] sm:$0x1] %v15_v20  ;;  %1016 = vmatprep.subr.bf16.mxu0 %v1052_v30  ;;  %v1137_v31 = vld [vmem:[%s1392_s3] ss:$0 sm:$0xff]  ;;  %1018 = vmatprep.mubr.msk.bf16.mxu0 %vm1053_vm1, %v1052_v30  ;;  %vm922_vm4 = vcmask 1042434  }
   0x3   :  { %v1142_v32 = vld [vmem:[%s1393_s4] ss:$0 sm:$0xff]  ;;  %vm924_vm5 = vcmask 1043459   ;;  %vm926_vm6 = vcmask 1044484   ;;  %vm928_vm7 = vcmask 1045509   ;;  %vm930_vm8 = vcmask 1046534  }
   0x4   :  { %v137_v3 = vsub.s32 4, %v1110_v1  ;;  %v151_v4 = vsub.s32 6, %v1110_v1  ;;  %v144_v5 = vsub.s32 5, %v1110_v1  ;;  %v158_v6 = vsub.s32 7, %v1110_v1  ;;  %v1151_v41 = vld [vmem:[%s1394_s5] ss:$0 sm:$0xff] }
   0x5   :  { %v1120_v9 = vsub.s32 0, %v1110_v1  ;;  %v116_v12 = vsub.s32 1, %v1110_v1  ;;  %v123_v16 = vsub.s32 2, %v1110_v1  ;;  %v130_v17 = vsub.s32 3, %v1110_v1  ;;  %v1048_v20 = vld [vmem:[%s1395_s8] sm:$0xff]  }
   0x6   :  { %v138_v7 = vrot.slane %v105_v2, %v137_v3  ;;  %v152_v8 = vrot.slane %v105_v2, %v151_v4  ;;  %v145_v10 = vrot.slane %v105_v2, %v144_v5  ;;  %v159_v11 = vrot.slane %v105_v2, %v158_v6  ;;  %1017 = vmatpush3.bf16.msra.mxu0 %v1048_v20 }
   0x7   :  { %v166_v14 = vrot.slane %v106_v13, %v1120_v9  ;;  %v173_v15 = vrot.slane %v106_v13, %v116_v12  ;;  %v180_v18 = vrot.slane %v106_v13, %v123_v16  ;;  %v187_v19 = vrot.slane %v106_v13, %v130_v17 }
   0x8   :  { %140 = vbcast.lane.b32.xlu0 %v138_v7, 256  ;;  %154 = vbcast.lane.b32.xlu1 %v152_v8, 256  ;;  %v117_v21 = vrot.slane %v105_v2, %v116_v12  ;;  %v110_v22 = vrot.slane %v105_v2, %v1120_v9  ;;  %v124_v24 = vrot.slane %v105_v2, %v123_v16  ;;  %vm932_vm9 = vcmask 1047559  }
   0x9   :  { %v131_v25 = vrot.slane %v105_v2, %v130_v17  ;;  %v194_v26 = vrot.slane %v106_v13, %v137_v3  ;;  %v201_v27 = vrot.slane %v106_v13, %v144_v5  ;;  %v208_v28 = vrot.slane %v106_v13, %v151_v4 }
   0xa   :  { %v215_v29 = vrot.slane %v106_v13, %v158_v6 }
   0xc   :  { %147 = vbcast.lane.b32.xlu0 %v145_v10, 256  ;;  %161 = vbcast.lane.b32.xlu1 %v159_v11, 256 }
  0x10   :  { %168 = vbcast.lane.b32.xlu0 %v166_v14, 256  ;;  %175 = vbcast.lane.b32.xlu1 %v173_v15, 256 }
  0x14   :  { %182 = vbcast.lane.b32.xlu0 %v180_v18, 256  ;;  %189 = vbcast.lane.b32.xlu1 %v187_v19, 256 }
  0x18   :  { %119 = vbcast.lane.b32.xlu1 %v117_v21, 256  ;;  %112 = vbcast.lane.b32.xlu0 %v110_v22, 256 }
  0x1c   :  { %126 = vbcast.lane.b32.xlu0 %v124_v24, 256  ;;  %133 = vbcast.lane.b32.xlu1 %v131_v25, 256 }
  0x20   :  { %196 = vbcast.lane.b32.xlu0 %v194_v26, 256  ;;  %203 = vbcast.lane.b32.xlu1 %v201_v27, 256  ;;  %v1049_v26 = vld [vmem:[%s1396_s0] sm:$0xff]  }
  0x21   :  { %1019 = vmatmul.mubr.msk.bf16.vlgmr.msra.gmra.mrb[0].mxu0 %vm60_vm2, %v1049_v26 }
  0x24   :  { %210 = vbcast.lane.b32.xlu0 %v208_v28, 256  ;;  %217 = vbcast.lane.b32.xlu1 %v215_v29, 256 }
  0x7a   :  { %v141_v33 = vpop.permute.xlu0 %140  ;;  %v155_v34 = vpop.permute.xlu1 %154 }
  0x7b   :  { %v230_v35 = vmul.f32 %v1137_v31, %v141_v33  ;;  %v232_v36 = vmul.f32 %v1137_v31, %v155_v34  ;;  %v956_v34 = vld [vmem:[#allocation2] ss:$0 sm:$0xff] }
  0x7d   :  { %v253_v37 = vadd.f32 %v1142_v32, %v230_v35  ;;  %v255_v38 = vadd.f32 %v1142_v32, %v232_v36 }
  0x7e   :  { %v148_v39 = vpop.permute.xlu0 %147  ;;  %v162_v40 = vpop.permute.xlu1 %161 }
  0x7f   :  { %v269_v42 = vmax.f32 %v253_v37, 0.0  ;;  %v271_v43 = vmax.f32 %v255_v38, 0.0  ;;  %v231_v44 = vmul.f32 %v1137_v31, %v148_v39  ;;  %v233_v45 = vmul.f32 %v1137_v31, %v162_v40 }
  0x81   :  { %v254_v46 = vadd.f32 %v1142_v32, %v231_v44  ;;  %v256_v47 = vadd.f32 %v1142_v32, %v233_v45  ;;  %v292_v48 = vmul.f32 %v1151_v41, %v269_v42  ;;  %v294_v49 = vmul.f32 %v1151_v41, %v271_v43  ;;  %v1050_v42 = vld [vmem:[%s1397_s7] sm:$0xff]  }
  0x82   :  { %v169_v50 = vpop.permute.xlu0 %168  ;;  %v176_v51 = vpop.permute.xlu1 %175  ;;  %1040 = vmatprep.subr.bf16.mxu1 %v1050_v42  ;;  %1022 = vmatprep.subr.bf16.mxu0 %v1050_v42 }
  0x83   :  { %v270_v52 = vmax.f32 %v254_v46, 0.0  ;;  %v272_v53 = vmax.f32 %v256_v47, 0.0  ;;  %v317_v54 = vsel %vm304_vm0, %v292_v48, 0.0  ;;  %v234_v55 = vmul.f32 %v1137_v31, %v169_v50  ;;  %1041 = vmatpush3.bf16.msra.mxu1 %v1050_v42  ;;  %1023 = vmatpush3.bf16.msra.mxu0 %v1050_v42 }
  0x84   :  { %318 = vadd.xlane.f32.xlu0 %v317_v54  ;;  %v235_v56 = vmul.f32 %v1137_v31, %v176_v51  ;;  %v323_v59 = vsel %vm304_vm0, %v294_v49, 0.0 }
  0x85   :  { %v257_v57 = vadd.f32 %v1142_v32, %v234_v55  ;;  %v293_v58 = vmul.f32 %v1151_v41, %v270_v52  ;;  %v295_v60 = vmul.f32 %v1151_v41, %v272_v53 }
  0x86   :  { %v258_v61 = vadd.f32 %v1142_v32, %v235_v56  ;;  %v183_v62 = vpop.permute.xlu0 %182  ;;  %v190_v63 = vpop.permute.xlu1 %189 }
  0x87   :  { %v273_v0 = vmax.f32 %v257_v57, 0.0  ;;  %v320_v2 = vsel %vm304_vm0, %v293_v58, 0.0  ;;  %v236_v3 = vmul.f32 %v1137_v31, %v183_v62  ;;  %v237_v5 = vmul.f32 %v1137_v31, %v190_v63 }
  0x88   :  { %321 = vadd.xlane.f32.xlu1 %v320_v2  ;;  %324 = vadd.xlane.f32.xlu0 %v323_v59  ;;  %v274_v4 = vmax.f32 %v258_v61, 0.0  ;;  %v326_v6 = vsel %vm304_vm0, %v295_v60, 0.0 }
  0x89   :  { %v259_v7 = vadd.f32 %v1142_v32, %v236_v3  ;;  %v296_v8 = vmul.f32 %v1151_v41, %v273_v0  ;;  %v260_v12 = vadd.f32 %v1142_v32, %v237_v5 }
  0x8a   :  { %v120_v10 = vpop.permute.xlu1 %119  ;;  %v1173_v11 = vpop.permute.xlu0 %112  ;;  %v297_v13 = vmul.f32 %v1151_v41, %v274_v4 }
  0x8b   :  { %v275_v14 = vmax.f32 %v259_v7, 0.0  ;;  %v329_v15 = vsel %vm304_vm0, %v296_v8, 0.0  ;;  %v227_v16 = vmul.f32 %v1137_v31, %v120_v10  ;;  %v276_v18 = vmax.f32 %v260_v12, 0.0 }
  0x8c   :  { %327 = vadd.xlane.f32.xlu0 %v326_v6  ;;  %v332_v19 = vsel %vm304_vm0, %v297_v13, 0.0  ;;  %v226_v0 = vmul.f32 %v1137_v31, %v1173_v11 }
  0x8d   :  { %v250_v21 = vadd.f32 %v1142_v32, %v227_v16  ;;  %v298_v22 = vmul.f32 %v1151_v41, %v275_v14  ;;  %v299_v25 = vmul.f32 %v1151_v41, %v276_v18 }
  0x8e   :  { %v127_v17 = vpop.permute.xlu0 %126  ;;  %v134_v24 = vpop.permute.xlu1 %133  ;;  %v249_v5 = vadd.f32 %v1142_v32, %v226_v0 }
  0x8f   :  { %v228_v23 = vmul.f32 %v1137_v31, %v127_v17  ;;  %v266_v27 = vmax.f32 %v250_v21, 0.0  ;;  %v335_v28 = vsel %vm304_vm0, %v298_v22, 0.0  ;;  %v229_v33 = vmul.f32 %v1137_v31, %v134_v24 }
  0x90   :  { %330 = vadd.xlane.f32.xlu0 %v329_v15  ;;  %v338_v30 = vsel %vm304_vm0, %v299_v25, 0.0  ;;  %v265_v8 = vmax.f32 %v249_v5, 0.0  ;;  %v999_v15 = vld [vmem:[%s1398_s1 + $0x10] sm:$0xff]  }
  0x91   :  { %v251_v29 = vadd.f32 %v1142_v32, %v228_v23  ;;  %v252_v37 = vadd.f32 %v1142_v32, %v229_v33  ;;  %v289_v38 = vmul.f32 %v1151_v41, %v266_v27  ;;  %v976_v18 = vunpack.c.l.bf16 %v999_v15  ;;  %v1001_v33 = vld [vmem:[%s1398_s1 + $0x20] sm:$0xff]  }
  0x92   :  { %v197_v35 = vpop.permute.xlu0 %196  ;;  %v204_v40 = vpop.permute.xlu1 %203 }
  0x93   :  { %v267_v36 = vmax.f32 %v251_v29, 0.0  ;;  %v238_v39 = vmul.f32 %v1137_v31, %v197_v35  ;;  %v239_v43 = vmul.f32 %v1137_v31, %v204_v40  ;;  %v268_v44 = vmax.f32 %v252_v37, 0.0 }
  0x94   :  { %333 = vadd.xlane.f32.xlu0 %v332_v19  ;;  %v308_v45 = vsel %vm304_vm0, %v289_v38, 0.0  ;;  %v977_v19 = vunpack.c.h.bf16 %v999_v15  ;;  %v985_v37 = vunpack.c.h.bf16 %v1001_v33 }
  0x95   :  { %v261_v46 = vadd.f32 %v1142_v32, %v238_v39  ;;  %v290_v47 = vmul.f32 %v1151_v41, %v267_v36  ;;  %v262_v49 = vadd.f32 %v1142_v32, %v239_v43  ;;  %v291_v52 = vmul.f32 %v1151_v41, %v268_v44  ;;  %v1002_v44 = vld [vmem:[%s1398_s1 + $0x28] sm:$0xff]  }
  0x96   :  { %v211_v48 = vpop.permute.xlu0 %210  ;;  %v218_v54 = vpop.permute.xlu1 %217  ;;  %v984_v36 = vunpack.c.l.bf16 %v1001_v33 }
  0x97   :  { %v277_v50 = vmax.f32 %v261_v46, 0.0  ;;  %v311_v51 = vsel %vm304_vm0, %v290_v47, 0.0  ;;  %v240_v53 = vmul.f32 %v1137_v31, %v211_v48  ;;  %v278_v55 = vmax.f32 %v262_v49, 0.0 }
  0x98   :  { %336 = vadd.xlane.f32.xlu0 %v335_v28  ;;  %v314_v56 = vsel %vm304_vm0, %v291_v52, 0.0  ;;  %v241_v59 = vmul.f32 %v1137_v31, %v218_v54  ;;  %v288_v31 = vmul.f32 %v1151_v41, %v265_v8  ;;  %v988_v47 = vunpack.c.l.bf16 %v1002_v44 }
  0x99   :  { %360 = vperm.xlu1 %1046, %v956_v34   ;;  %v263_v57 = vadd.f32 %v1142_v32, %v240_v53  ;;  %v300_v58 = vmul.f32 %v1151_v41, %v277_v50  ;;  %v301_v63 = vmul.f32 %v1151_v41, %v278_v55  ;;  %v989_v48 = vunpack.c.h.bf16 %v1002_v44 }
  0x9a   :  { %v264_v62 = vadd.f32 %v1142_v32, %v241_v59  ;;  %v305_v11 = vsel %vm304_vm0, %v288_v31, 0.0  ;;  %v1000_v32 = vld [vmem:[%s1398_s1 + $0x18] sm:$0xff]   ;;  %v967_v31 = vld [vmem:[%s1398_s1] sm:$0xff]  }
  0x9b   :  { %v279_v60 = vmax.f32 %v263_v57, 0.0  ;;  %v341_v61 = vsel %vm304_vm0, %v300_v58, 0.0  ;;  %v344_v3 = vsel %vm304_vm0, %v301_v63, 0.0  ;;  %v980_v16 = vunpack.c.l.bf16 %v1000_v32  ;;  %v1003_v58 = vld [vmem:[%s1398_s1 + $0x30] sm:$0xff]  }
  0x9c   :  { %339 = vadd.xlane.f32.xlu0 %v338_v30  ;;  %v280_v2 = vmax.f32 %v264_v62, 0.0  ;;  %v981_v17 = vunpack.c.h.bf16 %v1000_v32 }
  0x9d   :  { %v302_v4 = vmul.f32 %v1151_v41, %v279_v60  ;;  %v992_v60 = vunpack.c.l.bf16 %v1003_v58 }
  0x9e   :  { %v303_v7 = vmul.f32 %v1151_v41, %v280_v2 }
  0x9f   :  { %v347_v6 = vsel %vm304_vm0, %v302_v4, 0.0  ;;  %v1004_v4 = vld [vmem:[%s1398_s1 + $0x38] sm:$0xff]  }
  0xa0   :  { %309 = vadd.xlane.f32.xlu0 %v308_v45  ;;  %v350_v10 = vsel %vm304_vm0, %v303_v7, 0.0  ;;  %v996_v7 = vunpack.c.l.bf16 %v1004_v4  ;;  %v997_v8 = vunpack.c.h.bf16 %v1004_v4 }
  0xa4   :  { %312 = vadd.xlane.f32.xlu0 %v311_v51 }
  0xa8   :  { %315 = vadd.xlane.f32.xlu0 %v314_v56 }
  0xac   :  { %342 = vadd.xlane.f32.xlu0 %v341_v61  ;;  %v993_v61 = vunpack.c.h.bf16 %v1003_v58 }
  0xb0   :  { %345 = vadd.xlane.f32.xlu0 %v344_v3 }
  0xb4   :  { %348 = vadd.xlane.f32.xlu0 %v347_v6 }
  0xb8   :  { %351 = vadd.xlane.f32.xlu0 %v350_v10 }
  0xbd   :  { %306 = vadd.xlane.f32.xlu1 %v305_v11 }
  0xf4   :  { %v98_v33 = vpop.f32.mrb[0].mxu0 }
 0x111   :  { %v319_v12 = vpop.xlane.xlu0 %318 }
 0x115   :  { %v322_v13 = vpop.xlane.xlu1 %321  ;;  %v325_v14 = vpop.xlane.xlu0 %324 }
 0x119   :  { %v1233_v20 = vpop.permute.xlu1 %360  ;;  %v328_v41 = vpop.xlane.xlu0 %327 }
 0x11a   :  { %v369_v21 = vadd.f32 %v1233_v20, %v325_v14  ;;  %v370_v22 = vadd.f32 %v1233_v20, %v328_v41  ;;  %v367_v23 = vadd.f32 %v1233_v20, %v319_v12  ;;  %v368_v24 = vadd.f32 %v1233_v20, %v322_v13  ;;  %v998_v12 = vld [vmem:[%s1398_s1 + $0x8] sm:$0xff]  }
 0x11b   :  { %v973_v14 = vunpack.c.h.bf16 %v998_v12  ;;  %v972_v41 = vunpack.c.l.bf16 %v998_v12 }
 0x11c   :  { %v417_v25 = vmul.f32 %v980_v16, %v369_v21  ;;  %v418_v26 = vmul.f32 %v981_v17, %v370_v22  ;;  %v415_v27 = vmul.f32 %v976_v18, %v367_v23  ;;  %v416_v28 = vmul.f32 %v977_v19, %v368_v24 }
 0x11d   :  { %v331_v29 = vpop.xlane.xlu0 %330  ;;  %v969_v17 = vunpack.c.h.bf16 %v967_v31  ;;  %v968_v18 = vunpack.c.l.bf16 %v967_v31 }
 0x11e   :  { %v430_v34 = vpack.c.bf16 %v418_v26, %v417_v25  ;;  %v429_v35 = vpack.c.bf16 %v416_v28, %v415_v27  ;;  %v371_v30 = vadd.f32 %v1233_v20, %v331_v29 }
 0x120   :  { %1028 = vmatprep.mubr.msk.bf16.mxu1 %vm60_vm2, %v429_v35  ;;  %v419_v40 = vmul.f32 %v984_v36, %v371_v30  ;;  %v1054_v36 = vmov 1966171168  }
 0x121   :  { %v334_v38 = vpop.xlane.xlu0 %333  ;;  %1029 = vmatmul.mubr.msk.bf16.vlgmr.msra.gmra.mrb[0].mxu1 %vm60_vm2, %v430_v34  ;;  %v1020_v34 = vpop.f32.mrb[1].mxu0 }
 0x122   :  { %v372_v39 = vadd.f32 %v1233_v20, %v334_v38  ;;  %v101_v35 = vpop.f32.mrb[2].mxu0 }
 0x123   :  { %v1021_v30 = vpop.f32.mrb[3].mxu0 }
 0x124   :  { %v420_v42 = vmul.f32 %v985_v37, %v372_v39  ;;  %v568_v37 = vunpack.c.l.s4 %v1054_v36 }
 0x125   :  { %v337_v43 = vpop.xlane.xlu0 %336 }
 0x126   :  { %v431_v45 = vpack.c.bf16 %v420_v42, %v419_v40  ;;  %v373_v46 = vadd.f32 %v1233_v20, %v337_v43  ;;  %v569_v39 = vunpack.c.0.s8 %v568_v37 }
 0x128   :  { %1032 = vmatprep.mubr.msk.bf16.mxu1 %vm60_vm2, %v431_v45  ;;  %v421_v51 = vmul.f32 %v988_v47, %v373_v46  ;;  %v1285_v42 = vsub.s32 %v569_v39, %v1110_v1 }
 0x129   :  { %v340_v49 = vpop.xlane.xlu0 %339 }
 0x12a   :  { %v374_v50 = vadd.f32 %v1233_v20, %v340_v49 }
 0x12c   :  { %v422_v52 = vmul.f32 %v989_v48, %v374_v50 }
 0x12d   :  { %v310_v53 = vpop.xlane.xlu0 %309 }
 0x12e   :  { %v432_v54 = vpack.c.bf16 %v422_v52, %v421_v51  ;;  %v364_v16 = vadd.f32 %v1233_v20, %v310_v53 }
 0x130   :  { %1033 = vmatmul.mubr.msk.bf16.gmra.mrb[4].mxu1 %vm60_vm2, %v432_v54  ;;  %v412_v25 = vmul.f32 %v969_v17, %v364_v16 }
 0x131   :  { %v313_v55 = vpop.xlane.xlu0 %312 }
 0x132   :  { %v365_v19 = vadd.f32 %v1233_v20, %v313_v55 }
 0x134   :  { %v413_v27 = vmul.f32 %v972_v41, %v365_v19 }
 0x135   :  { %v316_v56 = vpop.xlane.xlu0 %315 }
 0x136   :  { %v366_v13 = vadd.f32 %v1233_v20, %v316_v56 }
 0x138   :  { %v414_v24 = vmul.f32 %v973_v14, %v366_v13 }
 0x139   :  { %v343_v57 = vpop.xlane.xlu0 %342 }
 0x13a   :  { %v375_v59 = vadd.f32 %v1233_v20, %v343_v57  ;;  %v428_v29 = vpack.c.bf16 %v414_v24, %v413_v27 }
 0x13c   :  { %v423_v0 = vmul.f32 %v992_v60, %v375_v59 }
 0x13d   :  { %v346_v62 = vpop.xlane.xlu0 %345 }
 0x13e   :  { %v376_v63 = vadd.f32 %v1233_v20, %v346_v62 }
 0x140   :  { %v424_v2 = vmul.f32 %v993_v61, %v376_v63 }
 0x141   :  { %v349_v3 = vpop.xlane.xlu0 %348 }
 0x142   :  { %v433_v5 = vpack.c.bf16 %v424_v2, %v423_v0  ;;  %v377_v6 = vadd.f32 %v1233_v20, %v349_v3 }
 0x144   :  { %1036 = vmatprep.mubr.msk.bf16.mxu1 %vm60_vm2, %v433_v5  ;;  %v425_v32 = vmul.f32 %v996_v7, %v377_v6 }
 0x145   :  { %v352_v10 = vpop.xlane.xlu0 %351 }
 0x146   :  { %v378_v11 = vadd.f32 %v1233_v20, %v352_v10 }
 0x148   :  { %v426_v15 = vmul.f32 %v997_v8, %v378_v11 }
 0x14a   :  { %v434_v21 = vpack.c.bf16 %v426_v15, %v425_v32  ;;  %v307_v22 = vpop.xlane.xlu1 %306 }
 0x14b   :  { %v363_v23 = vadd.f32 %v1233_v20, %v307_v22  ;;  %v949_v20 = vld [vmem:[%s1399_s9] ss:$0 sm:$0xff] }
 0x14c   :  { %1037 = vmatmul.mubr.msk.bf16.gmra.mrb[8].mxu1 %vm60_vm2, %v434_v21  ;;  %v1280_v38 = vadd.f32 %v949_v20, %v98_v33  ;;  %v102_v48 = vadd.f32 %v949_v20, %v101_v35 }
 0x14d   :  { %v411_v26 = vmul.f32 %v968_v18, %v363_v23 }
 0x14e   :  { %v566_v40 = vcombine.high %v1280_v38, %v1280_v38  ;;  %v622_v52 = vrot.slane %v102_v48, %v1285_v42  ;;  %v615_v22 = vcombine.high %v102_v48, %v102_v48  ;;  %v573_v48 = vrot.slane %v1280_v38, %v1285_v42 }
 0x14f   :  { %v427_v28 = vpack.c.bf16 %v412_v25, %v411_v26 }
 0x150   :  { %v580_v43 = vrot.slane %v566_v40, %v1285_v42  ;;  %v630_v59 = vcombine.high %v622_v52, %v622_v52  ;;  %v638_v63 = vrot.slane %v622_v52, %v1285_v42  ;;  %v629_v35 = vrot.slane %v615_v22, %v1285_v42 }
 0x151   :  { %1024 = vmatprep.mubr.msk.bf16.mxu0 %vm60_vm2, %v427_v28 }
 0x152   :  { %1025 = vmatmul.mubr.msk.bf16.vlgmr.msra.gmra.mrb[4].mxu0 %vm60_vm2, %v428_v29  ;;  %v582_v44 = vcombine.high %v580_v43, %v580_v43  ;;  %v596_v45 = vrot.slane %v580_v43, %v1285_v42  ;;  %v652_v0 = vrot.slane %v630_v59, %v1285_v42  ;;  %v660_v2 = vcombine.high %v638_v63, %v638_v63 }
 0x153   :  { %v699_v5 = vrot.slane %v638_v63, %v1120_v9  ;;  %v645_v52 = vrot.slane %v629_v35, %v1285_v42  ;;  %v1319_v59 = vrot.slane %v573_v48, %v1285_v42 }
 0x154   :  { %v610_v46 = vrot.slane %v582_v44, %v1285_v42  ;;  %v612_v47 = vcombine.high %v596_v45, %v596_v45  ;;  %v683_v51 = vrot.slane %v596_v45, %v1120_v9  ;;  %v662_v3 = vcombine.high %v652_v0, %v652_v0 }
 0x155   :  { %v707_v4 = vrot.slane %v660_v2, %v1120_v9  ;;  %v703_v8 = vrot.slane %v652_v0, %v1120_v9  ;;  %v631_v45 = vcombine.high %v629_v35, %v629_v35  ;;  %v661_v0 = vcombine.high %v645_v52, %v645_v52 }
 0x156   :  { %v614_v49 = vcombine.high %v610_v46, %v610_v46  ;;  %v691_v50 = vrot.slane %v612_v47, %v1120_v9  ;;  %v687_v54 = vrot.slane %v610_v46, %v1120_v9  ;;  %v711_v6 = vrot.slane %v662_v3, %v1120_v9 }
 0x158   :  { %v695_v53 = vrot.slane %v614_v49, %v1120_v9 }
 0x1f4   :  { %v1030_v1 = vpop.f32.mrb[0].mxu1 }
 0x1f5   :  { %v1295_v55 = vadd.f32 %v1030_v1, %v691_v50  ;;  %v517_v56 = vpop.f32.mrb[1].mxu1 }
 0x1f6   :  { %v1297_v57 = vadd.f32 %v683_v51, %v517_v56  ;;  %v1031_v58 = vpop.f32.mrb[2].mxu1  ;;  %v659_v56 = vrot.slane %v631_v45, %v1285_v42 }
 0x1f7   :  { %v1299_v60 = vadd.f32 %v1031_v58, %v695_v53  ;;  %v520_v61 = vpop.f32.mrb[3].mxu1  ;;  %v581_v58 = vcombine.high %v573_v48, %v573_v48  ;;  %v766_v38 = vmax.f32 %v1295_v55, 0.0 }
 0x1f8   :  { %v1301_v62 = vadd.f32 %v687_v54, %v520_v61  ;;  %v764_v2 = vmax.f32 %v1297_v57, 0.0 }
 0x1f9   :  { %v818_v57 = vsel %vm304_vm0, %v766_v38, 0.0 }
 0x203   :  { %v1034_v7 = vpop.f32.mrb[4].mxu1 }
 0x204   :  { %v754_v10 = vadd.f32 %v1034_v7, %v707_v4  ;;  %v533_v31 = vpop.f32.mrb[5].mxu1  ;;  %v767_v4 = vmax.f32 %v1299_v60, 0.0  ;;  %v663_v7 = vcombine.high %v659_v56, %v659_v56  ;;  %v715_v60 = vrot.slane %v645_v52, %v1120_v9 }
 0x205   :  { %v752_v11 = vadd.f32 %v699_v5, %v533_v31  ;;  %v1035_v12 = vpop.f32.mrb[6].mxu1  ;;  %v603_v31 = vrot.slane %v581_v58, %v1285_v42 }
 0x206   :  { %v770_v13 = vmax.f32 %v754_v10, 0.0  ;;  %v755_v14 = vadd.f32 %v1035_v12, %v711_v6  ;;  %v536_v32 = vpop.f32.mrb[7].mxu1  ;;  %v804_v12 = vsel %vm304_vm0, %v764_v2, 0.0 }
 0x207   :  { %v768_v15 = vmax.f32 %v752_v11, 0.0  ;;  %v753_v16 = vadd.f32 %v703_v8, %v536_v32  ;;  %v765_v8 = vmax.f32 %v1301_v62, 0.0  ;;  %v723_v11 = vrot.slane %v661_v0, %v1120_v9 }
 0x208   :  { %v846_v17 = vsel %vm304_vm0, %v770_v13, 0.0  ;;  %v771_v18 = vmax.f32 %v755_v14, 0.0  ;;  %v825_v13 = vsel %vm304_vm0, %v767_v4, 0.0  ;;  %v727_v14 = vrot.slane %v663_v7, %v1120_v9 }
 0x209   :  { %v847_v19 = vrot.slane %v846_v17, 4  ;;  %v832_v41 = vsel %vm304_vm0, %v768_v15, 0.0  ;;  %v769_v21 = vmax.f32 %v753_v16, 0.0  ;;  %v611_v62 = vcombine.high %v1319_v59, %v1319_v59 }
 0x20a   :  { %v833_v23 = vrot.slane %v832_v41, 4  ;;  %v853_v24 = vsel %vm304_vm0, %v771_v18, 0.0  ;;  %v811_v42 = vsel %vm304_vm0, %v765_v8, 0.0  ;;  %v719_v15 = vrot.slane %v659_v56, %v1120_v9 }
 0x20b   :  { %v848_v25 = vadd.f32 %v847_v19, %v846_v17  ;;  %v854_v26 = vrot.slane %v853_v24, 4  ;;  %v839_v27 = vsel %vm304_vm0, %v769_v21, 0.0  ;;  %v613_v16 = vcombine.high %v603_v31, %v603_v31 }
 0x20c   :  { %v834_v28 = vadd.f32 %v833_v23, %v832_v41  ;;  %v840_v29 = vrot.slane %v839_v27, 4  ;;  %v819_v17 = vrot.slane %v818_v57, 4  ;;  %v805_v18 = vrot.slane %v804_v12, 4 }
 0x20d   :  { %v849_v33 = vrot.slane %v848_v25, 2  ;;  %v855_v34 = vadd.f32 %v854_v26, %v853_v24  ;;  %v826_v21 = vrot.slane %v825_v13, 4  ;;  %v667_v24 = vrot.slane %v1319_v59, %v1120_v9 }
 0x20e   :  { %v835_v30 = vrot.slane %v834_v28, 2  ;;  %v841_v36 = vadd.f32 %v840_v29, %v839_v27  ;;  %v675_v29 = vrot.slane %v611_v62, %v1120_v9  ;;  %v679_v35 = vrot.slane %v613_v16, %v1120_v9 }
 0x20f   :  { %v850_v37 = vadd.f32 %v849_v33, %v848_v25  ;;  %v856_v20 = vrot.slane %v855_v34, 2  ;;  %v812_v25 = vrot.slane %v811_v42, 4 }
 0x210   :  { %v836_v39 = vadd.f32 %v835_v30, %v834_v28  ;;  %v842_v40 = vrot.slane %v841_v36, 2  ;;  %v671_v30 = vrot.slane %v603_v31, %v1120_v9 }
 0x211   :  { %v851_v43 = vrot.slane %v850_v37, 1  ;;  %v857_v44 = vadd.f32 %v856_v20, %v855_v34 }
 0x212   :  { %v837_v46 = vrot.slane %v836_v39, 1  ;;  %v843_v47 = vadd.f32 %v842_v40, %v841_v36  ;;  %v1346_v36 = vadd.f32 %v819_v17, %v818_v57  ;;  %v1351_v40 = vadd.f32 %v826_v21, %v825_v13 }
 0x213   :  { %v858_v49 = vrot.slane %v857_v44, 1  ;;  %v852_v53 = vadd.f32 %v851_v43, %v850_v37  ;;  %v1348_v37 = vadd.f32 %v805_v18, %v804_v12 }
 0x214   :  { %v838_v50 = vadd.f32 %v837_v46, %v836_v39  ;;  %v844_v51 = vrot.slane %v843_v47, 1 }
 0x215   :  { %v859_v1 = vadd.f32 %v858_v49, %v857_v44  ;;  %v898_v3 = vmul.f32 0.125, %v852_v53 }
 0x216   :  { %v845_v54 = vadd.f32 %v844_v51, %v843_v47  ;;  %v896_v61 = vmul.f32 0.125, %v838_v50  ;;  %v1354_v47 = vadd.f32 %v812_v25, %v811_v42 }
 0x217   :  { %v899_v5 = vmul.f32 0.125, %v859_v1 }
 0x218   :  { %v897_v63 = vmul.f32 0.125, %v845_v54 }
 0x21a   :  { %v934_v6 = vsel %vm920_vm3, %v897_v63, %v896_v61 }
 0x21b   :  { %v935_v10 = vsel %vm922_vm4, %v898_v3, %v934_v6 }
 0x21c   :  { %v1330_v55 = vsel %vm924_vm5, %v899_v5, %v935_v10 }
 0x21f   :  { %v1038_v32 = vpop.f32.mrb[8].mxu1 }
 0x220   :  { %v758_v19 = vadd.f32 %v1038_v32, %v723_v11  ;;  %v549_v41 = vpop.f32.mrb[9].mxu1 }
 0x221   :  { %v756_v22 = vadd.f32 %v715_v60, %v549_v41  ;;  %v1039_v23 = vpop.f32.mrb[10].mxu1 }
 0x222   :  { %v774_v26 = vmax.f32 %v758_v19, 0.0  ;;  %v759_v27 = vadd.f32 %v1039_v23, %v727_v14  ;;  %v552_v28 = vpop.f32.mrb[11].mxu1  ;;  %v807_v19 = vrot.slane %v1348_v37, 2 }
 0x223   :  { %v772_v33 = vmax.f32 %v756_v22, 0.0  ;;  %v757_v34 = vadd.f32 %v719_v15, %v552_v28 }
 0x224   :  { %v874_v20 = vsel %vm304_vm0, %v774_v26, 0.0  ;;  %v775_v39 = vmax.f32 %v759_v27, 0.0  ;;  %v814_v27 = vrot.slane %v1354_v47, 2 }
 0x225   :  { %v875_v43 = vrot.slane %v874_v20, 4  ;;  %v860_v44 = vsel %vm304_vm0, %v772_v33, 0.0  ;;  %v773_v45 = vmax.f32 %v757_v34, 0.0  ;;  %v1026_v46 = vpop.f32.mrb[4].mxu0 }
 0x226   :  { %v861_v48 = vrot.slane %v860_v44, 4  ;;  %v881_v49 = vsel %vm304_vm0, %v775_v39, 0.0  ;;  %v746_v9 = vadd.f32 %v1026_v46, %v675_v29  ;;  %v501_v50 = vpop.f32.mrb[5].mxu0  ;;  %v821_v39 = vrot.slane %v1346_v36, 2 }
 0x227   :  { %v876_v51 = vadd.f32 %v875_v43, %v874_v20  ;;  %v882_v52 = vrot.slane %v881_v49, 4  ;;  %v867_v53 = vsel %vm304_vm0, %v773_v45, 0.0  ;;  %v744_v1 = vadd.f32 %v667_v24, %v501_v50  ;;  %v1027_v54 = vpop.f32.mrb[6].mxu0 }
 0x228   :  { %v862_v56 = vadd.f32 %v861_v48, %v860_v44  ;;  %v868_v58 = vrot.slane %v867_v53, 4  ;;  %v762_v59 = vmax.f32 %v746_v9, 0.0  ;;  %v747_v61 = vadd.f32 %v1027_v54, %v679_v35  ;;  %v504_v63 = vpop.f32.mrb[7].mxu0 }
 0x229   :  { %v877_v0 = vrot.slane %v876_v51, 2  ;;  %v883_v38 = vadd.f32 %v882_v52, %v881_v49  ;;  %v760_v2 = vmax.f32 %v744_v1, 0.0  ;;  %v745_v3 = vadd.f32 %v671_v30, %v504_v63 }
 0x22a   :  { %v863_v4 = vrot.slane %v862_v56, 2  ;;  %v869_v5 = vadd.f32 %v868_v58, %v867_v53  ;;  %v790_v6 = vsel %vm304_vm0, %v762_v59, 0.0  ;;  %v763_v7 = vmax.f32 %v747_v61, 0.0 }
 0x22b   :  { %v878_v8 = vadd.f32 %v877_v0, %v876_v51  ;;  %v884_v10 = vrot.slane %v883_v38, 2  ;;  %v791_v31 = vrot.slane %v790_v6, 4  ;;  %v776_v11 = vsel %vm304_vm0, %v760_v2, 0.0 }
 0x22c   :  { %v864_v57 = vadd.f32 %v863_v4, %v862_v56  ;;  %v870_v12 = vrot.slane %v869_v5, 2  ;;  %v777_v60 = vrot.slane %v776_v11, 4  ;;  %v797_v13 = vsel %vm304_vm0, %v763_v7, 0.0 }
 0x22d   :  { %v879_v14 = vrot.slane %v878_v8, 1  ;;  %v885_v62 = vadd.f32 %v884_v10, %v883_v38  ;;  %v792_v42 = vadd.f32 %v791_v31, %v790_v6  ;;  %v798_v32 = vrot.slane %v797_v13, 4 }
 0x22e   :  { %v865_v15 = vrot.slane %v864_v57, 1  ;;  %v871_v16 = vadd.f32 %v870_v12, %v869_v5  ;;  %v778_v17 = vadd.f32 %v777_v60, %v776_v11  ;;  %v761_v18 = vmax.f32 %v745_v3, 0.0 }
 0x22f   :  { %v886_v41 = vrot.slane %v885_v62, 1  ;;  %v793_v21 = vrot.slane %v792_v42, 2  ;;  %v799_v22 = vadd.f32 %v798_v32, %v797_v13  ;;  %v880_v28 = vadd.f32 %v879_v14, %v878_v8 }
 0x230   :  { %v866_v23 = vadd.f32 %v865_v15, %v864_v57  ;;  %v872_v24 = vrot.slane %v871_v16, 1  ;;  %v779_v25 = vrot.slane %v778_v17, 2  ;;  %v783_v26 = vsel %vm304_vm0, %v761_v18, 0.0 }
 0x231   :  { %v887_v29 = vadd.f32 %v886_v41, %v885_v62  ;;  %v800_v33 = vrot.slane %v799_v22, 2  ;;  %v784_v20 = vrot.slane %v783_v26, 4  ;;  %v828_v43 = vrot.slane %v1351_v40, 2 }
 0x232   :  { %v900_v34 = vmul.f32 0.125, %v866_v23  ;;  %v873_v35 = vadd.f32 %v872_v24, %v871_v16  ;;  %v780_v30 = vadd.f32 %v779_v25, %v778_v17  ;;  %v794_v44 = vadd.f32 %v793_v21, %v792_v42 }
 0x233   :  { %v801_v48 = vadd.f32 %v800_v33, %v799_v22  ;;  %v785_v49 = vadd.f32 %v784_v20, %v783_v26  ;;  %v808_v9 = vadd.f32 %v807_v19, %v1348_v37  ;;  %v815_v50 = vadd.f32 %v814_v27, %v1354_v47 }
 0x234   :  { %v937_v45 = vsel %vm926_vm6, %v900_v34, %v1330_v55  ;;  %v901_v46 = vmul.f32 0.125, %v873_v35  ;;  %v902_v51 = vmul.f32 0.125, %v880_v28  ;;  %v903_v52 = vmul.f32 0.125, %v887_v29 }
 0x235   :  { %v781_v1 = vrot.slane %v780_v30, 1  ;;  %v786_v54 = vrot.slane %v785_v49, 2  ;;  %v822_v56 = vadd.f32 %v821_v39, %v1346_v36  ;;  %v795_v59 = vrot.slane %v794_v44, 1 }
 0x236   :  { %v938_v53 = vsel %vm928_vm7, %v901_v46, %v937_v45  ;;  %v829_v55 = vadd.f32 %v828_v43, %v1351_v40  ;;  %v802_v63 = vrot.slane %v801_v48, 1  ;;  %v809_v0 = vrot.slane %v808_v9, 1 }
 0x237   :  { %v939_v58 = vsel %vm930_vm8, %v902_v51, %v938_v53  ;;  %v787_v37 = vadd.f32 %v786_v54, %v785_v49  ;;  %v816_v47 = vrot.slane %v815_v50, 1  ;;  %v782_v38 = vadd.f32 %v781_v1, %v780_v30 }
 0x238   :  { %v940_v61 = vsel %vm932_vm9, %v903_v52, %v939_v58  ;;  %v823_v3 = vrot.slane %v822_v56, 1  ;;  %v796_v36 = vadd.f32 %v795_v59, %v794_v44  ;;  %v830_v4 = vrot.slane %v829_v55, 1 }
 0x239   :  { %944 = vst.msk [vmem:[%s1400_s10 + $0x8] sm:$0xff] %vm304_vm0, %v940_v61  ;;  %v788_v2 = vrot.slane %v787_v37, 1  ;;  %v803_v5 = vadd.f32 %v802_v63, %v801_v48  ;;  %v810_v7 = vadd.f32 %v809_v0, %v808_v9  ;;  %v817_v40 = vadd.f32 %v816_v47, %v815_v50 }
 0x23a   :  { %v888_v8 = vmul.f32 0.125, %v782_v38  ;;  %v824_v31 = vadd.f32 %v823_v3, %v822_v56  ;;  %v890_v11 = vmul.f32 0.125, %v796_v36  ;;  %v831_v57 = vadd.f32 %v830_v4, %v829_v55 }
 0x23b   :  { %v789_v6 = vadd.f32 %v788_v2, %v787_v37  ;;  %v891_v12 = vmul.f32 0.125, %v803_v5  ;;  %v892_v13 = vmul.f32 0.125, %v810_v7  ;;  %v893_v62 = vmul.f32 0.125, %v817_v40 }
 0x23c   :  { %v894_v32 = vmul.f32 0.125, %v824_v31  ;;  %v895_v16 = vmul.f32 0.125, %v831_v57 }
 0x23d   :  { %v889_v10 = vmul.f32 0.125, %v789_v6 }
 0x23f   :  { %v921_v60 = vsel %vm920_vm3, %v889_v10, %v888_v8 }
 0x240   :  { %v923_v14 = vsel %vm922_vm4, %v890_v11, %v921_v60 }
 0x241   :  { %v925_v42 = vsel %vm924_vm5, %v891_v12, %v923_v14 }
 0x242   :  { %v927_v15 = vsel %vm926_vm6, %v892_v13, %v925_v42 }
 0x243   :  { %v929_v17 = vsel %vm928_vm7, %v893_v62, %v927_v15 }
 0x244   :  { %v931_v18 = vsel %vm930_vm8, %v894_v32, %v929_v17 }
 0x245   :  { %v933_v19 = vsel %vm932_vm9, %v895_v16, %v931_v18 }
 0x246   :  { %943 = vst.msk [vmem:[%s1400_s10] sm:$0xff] %vm304_vm0, %v933_v19 }

// kernel: pgnn_forward.5
= control target key start
LH: loop header
LB: loop body
LE: loop exit
PB: predicated region body
PF: predicated region fallthrough
CT: control target
= control target key end

     0   :  { %v123_v0 = vlaneseq  ;;  %v1457_v23 = vmov 0   ;;  %v1458_v30 = vmov 0.0   ;;  %vm320_vm0 = vcmask 130048   ;;  %s1987_s2 = inlined_call_operand.vmem [shape: f32[16,8], index: 2, kind: input, shape index: {}]   ;;  %s1988_s6 = inlined_call_operand.<no memory space> [shape: f32[1,1], index: 6, kind: input, shape index: {}]   ;;  %s1989_s8 = inlined_call_operand.vmem [shape: bf16[32,16], index: 8, kind: input, shape index: {}]   ;;  %s1990_s3 = inlined_call_operand.vmem [shape: f32[1,16], index: 3, kind: input, shape index: {}]   ;;  %s1991_s4 = inlined_call_operand.vmem [shape: f32[1,16], index: 4, kind: input, shape index: {}]   ;;  %s1992_s5 = inlined_call_operand.vmem [shape: f32[1,16], index: 5, kind: input, shape index: {}]   ;;  %s1993_s0 = inlined_call_operand.vmem [shape: bf16[16,32], index: 0, kind: input, shape index: {}]   ;;  %s1994_s7 = inlined_call_operand.vmem [shape: bf16[32,16], index: 7, kind: input, shape index: {}]   ;;  %s1995_s1 = inlined_call_operand.vmem [shape: bf16[16,8,32], index: 1, kind: input, shape index: {}]   ;;  %s1996_s11 = inlined_call_operand.<no memory space> [shape: f32[1,1], index: 11, kind: input, shape index: {}]   ;;  %s1997_s9 = inlined_call_operand.vmem [shape: f32[1,16], index: 9, kind: input, shape index: {}]   ;;  %s1998_s10 = inlined_call_operand.vmem [shape: f32[1,16], index: 10, kind: input, shape index: {}]   ;;  %s1999_s12 = inlined_call_operand.vmem [shape: f32[16,8], index: 12, kind: output, shape index: {}]  }
   0x1   :  { %v121_v2 = vld [vmem:[%s1987_s2] sm:$0xff]  ;;  %v122_v13 = vld [vmem:[%s1987_s2 + $0x8] sm:$0xff]  ;;  %v17_v20 = vstv %s1988_s6  ;;  %1414 = vset.pattern.permute.xlu1 %v1457_v23  ;;  %1415 = vset.pattern.permute.xlu0 %v1457_v23  ;;  %vm1459_vm1 = vmmov 0   ;;  %vm76_vm2 = vcmask 261120   ;;  %vm995_vm3 = vcmask 1041409  }
   0x2   :  { %v1527_v1 = vshrl.u32 %v123_v0, 7  ;;  %18 = vst [vmem:[#allocation2] sm:$0x1] %v17_v20  ;;  %1378 = vmatprep.subr.bf16.mxu0 %v1458_v30  ;;  %v1416_v31 = vld [vmem:[%s1989_s8] sm:$0xff]   ;;  %1382 = vmatprep.mubr.msk.bf16.mxu0 %vm1459_vm1, %v1458_v30  ;;  %vm997_vm4 = vcmask 1042434   ;;  %vm999_vm5 = vcmask 1043459  }
   0x3   :  { %1379 = vmatpush3.bf16.msra.mxu0 %v1416_v31  ;;  %v1586_v32 = vld [vmem:[%s1990_s3] ss:$0 sm:$0xff]  ;;  %vm1001_vm6 = vcmask 1044484   ;;  %vm1003_vm7 = vcmask 1045509   ;;  %vm1005_vm8 = vcmask 1046534   ;;  %vm1007_vm9 = vcmask 1047559  }
   0x4   :  { %v1533_v3 = vsub.s32 4, %v1527_v1  ;;  %v1536_v4 = vsub.s32 6, %v1527_v1  ;;  %v1539_v5 = vsub.s32 5, %v1527_v1  ;;  %v1542_v6 = vsub.s32 7, %v1527_v1  ;;  %1380 = vmatprep.subr.bf16.mxu0 %v1458_v30  ;;  %v1591_v33 = vld [vmem:[%s1991_s4] ss:$0 sm:$0xff] }
   0x5   :  { %v1547_v9 = vsub.s32 0, %v1527_v1  ;;  %v1552_v12 = vsub.s32 1, %v1527_v1  ;;  %v1560_v16 = vsub.s32 2, %v1527_v1  ;;  %v1563_v17 = vsub.s32 3, %v1527_v1  ;;  %v1600_v42 = vld [vmem:[%s1992_s5] ss:$0 sm:$0xff] }
   0x6   :  { %v154_v7 = vrot.slane %v121_v2, %v1533_v3  ;;  %v168_v8 = vrot.slane %v121_v2, %v1536_v4  ;;  %v161_v10 = vrot.slane %v121_v2, %v1539_v5  ;;  %v175_v11 = vrot.slane %v121_v2, %v1542_v6  ;;  %v1419_v30 = vld [vmem:[%s1994_s7] sm:$0xff]  }
   0x7   :  { %v182_v14 = vrot.slane %v122_v13, %v1547_v9  ;;  %v189_v15 = vrot.slane %v122_v13, %v1552_v12  ;;  %v196_v18 = vrot.slane %v122_v13, %v1560_v16  ;;  %v203_v19 = vrot.slane %v122_v13, %v1563_v17  ;;  %1406 = vmatprep.subr.bf16.mxu1 %v1419_v30 }
   0x8   :  { %156 = vbcast.lane.b32.xlu0 %v154_v7, 256  ;;  %170 = vbcast.lane.b32.xlu1 %v168_v8, 256  ;;  %v133_v21 = vrot.slane %v121_v2, %v1552_v12  ;;  %v126_v22 = vrot.slane %v121_v2, %v1547_v9  ;;  %v140_v24 = vrot.slane %v121_v2, %v1560_v16  ;;  %vm1018_vm10 = vcmask 64512  }
   0x9   :  { %v147_v25 = vrot.slane %v121_v2, %v1563_v17  ;;  %v210_v26 = vrot.slane %v122_v13, %v1533_v3  ;;  %v217_v27 = vrot.slane %v122_v13, %v1539_v5  ;;  %v224_v28 = vrot.slane %v122_v13, %v1536_v4  ;;  %1408 = vmatpush3.bf16.msra.mxu1 %v1419_v30 }
   0xa   :  { %v231_v29 = vrot.slane %v122_v13, %v1542_v6 }
   0xc   :  { %163 = vbcast.lane.b32.xlu0 %v161_v10, 256  ;;  %177 = vbcast.lane.b32.xlu1 %v175_v11, 256 }
  0x10   :  { %184 = vbcast.lane.b32.xlu0 %v182_v14, 256  ;;  %191 = vbcast.lane.b32.xlu1 %v189_v15, 256 }
  0x14   :  { %198 = vbcast.lane.b32.xlu0 %v196_v18, 256  ;;  %205 = vbcast.lane.b32.xlu1 %v203_v19, 256 }
  0x18   :  { %135 = vbcast.lane.b32.xlu1 %v133_v21, 256  ;;  %128 = vbcast.lane.b32.xlu0 %v126_v22, 256 }
  0x1c   :  { %142 = vbcast.lane.b32.xlu0 %v140_v24, 256  ;;  %149 = vbcast.lane.b32.xlu1 %v147_v25, 256 }
  0x20   :  { %212 = vbcast.lane.b32.xlu0 %v210_v26, 256  ;;  %219 = vbcast.lane.b32.xlu1 %v217_v27, 256 }
  0x24   :  { %226 = vbcast.lane.b32.xlu0 %v224_v28, 256  ;;  %233 = vbcast.lane.b32.xlu1 %v231_v29, 256  ;;  %v1417_v29 = vld [vmem:[%s1989_s8 + $0x8] sm:$0xff]  }
  0x25   :  { %1381 = vmatpush3.bf16.msra.mxu0 %v1417_v29 }
  0x26   :  { %1386 = vmatprep.subr.bf16.mxu0 %v1419_v30 }
  0x7a   :  { %v157_v34 = vpop.permute.xlu0 %156  ;;  %v171_v35 = vpop.permute.xlu1 %170 }
  0x7b   :  { %v246_v36 = vmul.f32 %v1586_v32, %v157_v34  ;;  %v248_v37 = vmul.f32 %v1586_v32, %v171_v35 }
  0x7d   :  { %v269_v38 = vadd.f32 %v1591_v33, %v246_v36  ;;  %v271_v39 = vadd.f32 %v1591_v33, %v248_v37 }
  0x7e   :  { %v164_v40 = vpop.permute.xlu0 %163  ;;  %v178_v41 = vpop.permute.xlu1 %177 }
  0x7f   :  { %v285_v43 = vmax.f32 %v269_v38, 0.0  ;;  %v287_v44 = vmax.f32 %v271_v39, 0.0  ;;  %v247_v45 = vmul.f32 %v1586_v32, %v164_v40  ;;  %v249_v46 = vmul.f32 %v1586_v32, %v178_v41  ;;  %v1418_v38 = vld [vmem:[%s1993_s0] sm:$0xff]  }
  0x80   :  { %v1313_v41 = vld [vmem:[#allocation2] ss:$0 sm:$0xff]  ;;  %1383 = vmatmul.mubr.msk.bf16.vlgmr.msra.gmra.mrb[0].mxu0 %vm76_vm2, %v1418_v38 }
  0x81   :  { %v270_v47 = vadd.f32 %v1591_v33, %v247_v45  ;;  %v272_v48 = vadd.f32 %v1591_v33, %v249_v46  ;;  %v308_v49 = vmul.f32 %v1600_v42, %v285_v43  ;;  %v310_v50 = vmul.f32 %v1600_v42, %v287_v44  ;;  %1387 = vmatpush3.bf16.msra.mxu0 %v1419_v30 }
  0x82   :  { %v185_v51 = vpop.permute.xlu0 %184  ;;  %v192_v52 = vpop.permute.xlu1 %191 }
  0x83   :  { %v286_v53 = vmax.f32 %v270_v47, 0.0  ;;  %v288_v54 = vmax.f32 %v272_v48, 0.0  ;;  %v333_v55 = vsel %vm320_vm0, %v308_v49, 0.0  ;;  %v250_v56 = vmul.f32 %v1586_v32, %v185_v51 }
  0x84   :  { %334 = vadd.xlane.f32.xlu0 %v333_v55  ;;  %v251_v57 = vmul.f32 %v1586_v32, %v192_v52  ;;  %v339_v60 = vsel %vm320_vm0, %v310_v50, 0.0  ;;  %v1420_v52 = vld [vmem:[%s1994_s7 + $0x8] sm:$0xff]  }
  0x85   :  { %v273_v58 = vadd.f32 %v1591_v33, %v250_v56  ;;  %v309_v59 = vmul.f32 %v1600_v42, %v286_v53  ;;  %v311_v61 = vmul.f32 %v1600_v42, %v288_v54  ;;  %1407 = vmatprep.subr.bf16.mxu1 %v1420_v52  ;;  %1388 = vmatprep.subr.bf16.mxu0 %v1420_v52 }
  0x86   :  { %v274_v62 = vadd.f32 %v1591_v33, %v251_v57  ;;  %v199_v63 = vpop.permute.xlu0 %198  ;;  %v206_v2 = vpop.permute.xlu1 %205  ;;  %1409 = vmatpush3.bf16.msra.mxu1 %v1420_v52  ;;  %1389 = vmatpush3.bf16.msra.mxu0 %v1420_v52 }
  0x87   :  { %v289_v7 = vmax.f32 %v273_v58, 0.0  ;;  %v336_v8 = vsel %vm320_vm0, %v309_v59, 0.0  ;;  %v252_v10 = vmul.f32 %v1586_v32, %v199_v63  ;;  %v253_v13 = vmul.f32 %v1586_v32, %v206_v2 }
  0x88   :  { %337 = vadd.xlane.f32.xlu1 %v336_v8  ;;  %340 = vadd.xlane.f32.xlu0 %v339_v60  ;;  %v290_v11 = vmax.f32 %v274_v62, 0.0  ;;  %v342_v14 = vsel %vm320_vm0, %v311_v61, 0.0 }
  0x89   :  { %v275_v15 = vadd.f32 %v1591_v33, %v252_v10  ;;  %v312_v18 = vmul.f32 %v1600_v42, %v289_v7  ;;  %v276_v21 = vadd.f32 %v1591_v33, %v253_v13 }
  0x8a   :  { %v136_v19 = vpop.permute.xlu1 %135  ;;  %v1622_v20 = vpop.permute.xlu0 %128  ;;  %v313_v22 = vmul.f32 %v1600_v42, %v290_v11 }
  0x8b   :  { %v291_v23 = vmax.f32 %v275_v15, 0.0  ;;  %v345_v24 = vsel %vm320_vm0, %v312_v18, 0.0  ;;  %v243_v25 = vmul.f32 %v1586_v32, %v136_v19  ;;  %v292_v27 = vmax.f32 %v276_v21, 0.0 }
  0x8c   :  { %343 = vadd.xlane.f32.xlu0 %v342_v14  ;;  %v348_v28 = vsel %vm320_vm0, %v313_v22, 0.0  ;;  %v242_v21 = vmul.f32 %v1586_v32, %v1622_v20 }
  0x8d   :  { %v266_v31 = vadd.f32 %v1591_v33, %v243_v25  ;;  %v314_v34 = vmul.f32 %v1600_v42, %v291_v23  ;;  %v315_v37 = vmul.f32 %v1600_v42, %v292_v27 }
  0x8e   :  { %v143_v26 = vpop.permute.xlu0 %142  ;;  %v150_v36 = vpop.permute.xlu1 %149  ;;  %v265_v25 = vadd.f32 %v1591_v33, %v242_v21 }
  0x8f   :  { %v244_v35 = vmul.f32 %v1586_v32, %v143_v26  ;;  %v282_v39 = vmax.f32 %v266_v31, 0.0  ;;  %v351_v40 = vsel %vm320_vm0, %v314_v34, 0.0  ;;  %v245_v44 = vmul.f32 %v1586_v32, %v150_v36  ;;  %v1359_v36 = vld [vmem:[%s1995_s1 + $0x10] sm:$0xff]  }
  0x90   :  { %346 = vadd.xlane.f32.xlu0 %v345_v24  ;;  %v354_v46 = vsel %vm320_vm0, %v315_v37, 0.0 }
  0x91   :  { %v267_v43 = vadd.f32 %v1591_v33, %v244_v35  ;;  %v268_v48 = vadd.f32 %v1591_v33, %v245_v44  ;;  %v305_v49 = vmul.f32 %v1600_v42, %v282_v39  ;;  %v1336_v39 = vunpack.c.l.bf16 %v1359_v36 }
  0x92   :  { %v213_v45 = vpop.permute.xlu0 %212  ;;  %v220_v51 = vpop.permute.xlu1 %219 }
  0x93   :  { %v283_v47 = vmax.f32 %v267_v43, 0.0  ;;  %v254_v50 = vmul.f32 %v1586_v32, %v213_v45  ;;  %v255_v53 = vmul.f32 %v1586_v32, %v220_v51  ;;  %v284_v54 = vmax.f32 %v268_v48, 0.0  ;;  %v1361_v51 = vld [vmem:[%s1995_s1 + $0x20] sm:$0xff]  }
  0x94   :  { %349 = vadd.xlane.f32.xlu0 %v348_v28  ;;  %v324_v55 = vsel %vm320_vm0, %v305_v49, 0.0  ;;  %v281_v28 = vmax.f32 %v265_v25, 0.0 }
  0x95   :  { %v277_v56 = vadd.f32 %v1591_v33, %v254_v50  ;;  %v306_v57 = vmul.f32 %v1600_v42, %v283_v47  ;;  %v278_v59 = vadd.f32 %v1591_v33, %v255_v53  ;;  %v307_v62 = vmul.f32 %v1600_v42, %v284_v54 }
  0x96   :  { %v227_v58 = vpop.permute.xlu0 %226  ;;  %v234_v2 = vpop.permute.xlu1 %233 }
  0x97   :  { %v293_v60 = vmax.f32 %v277_v56, 0.0  ;;  %v327_v61 = vsel %vm320_vm0, %v306_v57, 0.0  ;;  %v256_v63 = vmul.f32 %v1586_v32, %v227_v58  ;;  %v294_v7 = vmax.f32 %v278_v59, 0.0 }
  0x98   :  { %352 = vadd.xlane.f32.xlu0 %v351_v40  ;;  %v330_v8 = vsel %vm320_vm0, %v307_v62, 0.0  ;;  %v257_v13 = vmul.f32 %v1586_v32, %v234_v2  ;;  %v304_v32 = vmul.f32 %v1600_v42, %v281_v28  ;;  %v1337_v40 = vunpack.c.h.bf16 %v1359_v36  ;;  %v1362_v62 = vld [vmem:[%s1995_s1 + $0x28] sm:$0xff]  }
  0x99   :  { %376 = vperm.xlu1 %1414, %v1313_v41   ;;  %v279_v10 = vadd.f32 %v1591_v33, %v256_v63  ;;  %v316_v11 = vmul.f32 %v1600_v42, %v293_v60  ;;  %v317_v19 = vmul.f32 %v1600_v42, %v294_v7  ;;  %v1345_v56 = vunpack.c.h.bf16 %v1361_v51 }
  0x9a   :  { %v280_v18 = vadd.f32 %v1591_v33, %v257_v13  ;;  %v321_v20 = vsel %vm320_vm0, %v304_v32, 0.0  ;;  %v1360_v33 = vld [vmem:[%s1995_s1 + $0x18] sm:$0xff]   ;;  %v1348_v7 = vunpack.c.l.bf16 %v1362_v62 }
  0x9b   :  { %v295_v14 = vmax.f32 %v279_v10, 0.0  ;;  %v357_v15 = vsel %vm320_vm0, %v316_v11, 0.0  ;;  %v360_v23 = vsel %vm320_vm0, %v317_v19, 0.0  ;;  %v1340_v37 = vunpack.c.l.bf16 %v1360_v33 }
  0x9c   :  { %355 = vadd.xlane.f32.xlu0 %v354_v46  ;;  %v296_v22 = vmax.f32 %v280_v18, 0.0  ;;  %v1341_v38 = vunpack.c.h.bf16 %v1360_v33 }
  0x9d   :  { %v318_v24 = vmul.f32 %v1600_v42, %v295_v14 }
  0x9e   :  { %v319_v27 = vmul.f32 %v1600_v42, %v296_v22 }
  0x9f   :  { %v363_v26 = vsel %vm320_vm0, %v318_v24, 0.0 }
  0xa0   :  { %325 = vadd.xlane.f32.xlu0 %v324_v55  ;;  %v366_v29 = vsel %vm320_vm0, %v319_v27, 0.0  ;;  %v1344_v55 = vunpack.c.l.bf16 %v1361_v51 }
  0xa4   :  { %328 = vadd.xlane.f32.xlu0 %v327_v61 }
  0xa8   :  { %331 = vadd.xlane.f32.xlu0 %v330_v8  ;;  %v1349_v8 = vunpack.c.h.bf16 %v1362_v62 }
  0xac   :  { %358 = vadd.xlane.f32.xlu0 %v357_v15 }
  0xb0   :  { %361 = vadd.xlane.f32.xlu0 %v360_v23  ;;  %v1363_v23 = vld [vmem:[%s1995_s1 + $0x30] sm:$0xff]  }
  0xb1   :  { %v1352_v25 = vunpack.c.l.bf16 %v1363_v23 }
  0xb4   :  { %364 = vadd.xlane.f32.xlu0 %v363_v26  ;;  %v1353_v26 = vunpack.c.h.bf16 %v1363_v23 }
  0xb8   :  { %367 = vadd.xlane.f32.xlu0 %v366_v29 }
  0xbd   :  { %322 = vadd.xlane.f32.xlu1 %v321_v20 }
 0x111   :  { %v335_v31 = vpop.xlane.xlu0 %334 }
 0x115   :  { %v338_v34 = vpop.xlane.xlu1 %337  ;;  %v341_v35 = vpop.xlane.xlu0 %340 }
 0x119   :  { %v1685_v41 = vpop.permute.xlu1 %376  ;;  %v344_v42 = vpop.xlane.xlu0 %343 }
 0x11a   :  { %v385_v43 = vadd.f32 %v1685_v41, %v341_v35  ;;  %v386_v44 = vadd.f32 %v1685_v41, %v344_v42  ;;  %v383_v45 = vadd.f32 %v1685_v41, %v335_v31  ;;  %v384_v30 = vadd.f32 %v1685_v41, %v338_v34  ;;  %v1364_v31 = vld [vmem:[%s1995_s1 + $0x38] sm:$0xff]  }
 0x11b   :  { %v1356_v33 = vunpack.c.l.bf16 %v1364_v31  ;;  %v1357_v36 = vunpack.c.h.bf16 %v1364_v31 }
 0x11c   :  { %v433_v46 = vmul.f32 %v1340_v37, %v385_v43  ;;  %v434_v47 = vmul.f32 %v1341_v38, %v386_v44  ;;  %v431_v48 = vmul.f32 %v1336_v39, %v383_v45  ;;  %v432_v49 = vmul.f32 %v1337_v40, %v384_v30  ;;  %v1327_v38 = vld [vmem:[%s1995_s1] sm:$0xff]   ;;  %v1358_v40 = vld [vmem:[%s1995_s1 + $0x8] sm:$0xff]  }
 0x11d   :  { %v347_v50 = vpop.xlane.xlu0 %346  ;;  %v1333_v43 = vunpack.c.h.bf16 %v1358_v40 }
 0x11e   :  { %v446_v52 = vpack.c.bf16 %v434_v47, %v433_v46  ;;  %v445_v53 = vpack.c.bf16 %v432_v49, %v431_v48  ;;  %v387_v54 = vadd.f32 %v1685_v41, %v347_v50  ;;  %v1329_v46 = vunpack.c.h.bf16 %v1327_v38 }
 0x11f   :  { %v1328_v47 = vunpack.c.l.bf16 %v1327_v38  ;;  %v1332_v49 = vunpack.c.l.bf16 %v1358_v40 }
 0x120   :  { %1394 = vmatprep.mubr.msk.bf16.mxu1 %vm76_vm2, %v445_v53  ;;  %v435_v59 = vmul.f32 %v1344_v55, %v387_v54 }
 0x121   :  { %v350_v57 = vpop.xlane.xlu0 %349  ;;  %1395 = vmatmul.mubr.msk.bf16.vlgmr.msra.gmra.mrb[0].mxu1 %vm76_vm2, %v446_v52 }
 0x122   :  { %v388_v58 = vadd.f32 %v1685_v41, %v350_v57 }
 0x124   :  { %v436_v60 = vmul.f32 %v1345_v56, %v388_v58 }
 0x125   :  { %v353_v61 = vpop.xlane.xlu0 %352 }
 0x126   :  { %v447_v63 = vpack.c.bf16 %v436_v60, %v435_v59  ;;  %v389_v2 = vadd.f32 %v1685_v41, %v353_v61 }
 0x128   :  { %1398 = vmatprep.mubr.msk.bf16.mxu1 %vm76_vm2, %v447_v63  ;;  %v437_v13 = vmul.f32 %v1348_v7, %v389_v2  ;;  %v1460_v63 = vmov 1966171168   ;;  %v1305_v7 = vld [vmem:[%s1997_s9] ss:$0 sm:$0xff] }
 0x129   :  { %v356_v10 = vpop.xlane.xlu0 %355  ;;  %v592_v2 = vunpack.c.l.s4 %v1460_v63 }
 0x12a   :  { %v390_v11 = vadd.f32 %v1685_v41, %v356_v10 }
 0x12b   :  { %v593_v10 = vunpack.c.0.s8 %v592_v2 }
 0x12c   :  { %v438_v14 = vmul.f32 %v1349_v8, %v390_v11 }
 0x12d   :  { %v326_v15 = vpop.xlane.xlu0 %325 }
 0x12e   :  { %v448_v18 = vpack.c.bf16 %v438_v14, %v437_v13  ;;  %v380_v30 = vadd.f32 %v1685_v41, %v326_v15  ;;  %v596_v13 = vsub.s32 %v593_v10, %v1527_v1 }
 0x130   :  { %1399 = vmatmul.mubr.msk.bf16.gmra.mrb[4].mxu1 %vm76_vm2, %v448_v18  ;;  %v428_v54 = vmul.f32 %v1329_v46, %v380_v30 }
 0x131   :  { %v329_v19 = vpop.xlane.xlu0 %328 }
 0x132   :  { %v381_v48 = vadd.f32 %v1685_v41, %v329_v19 }
 0x134   :  { %v429_v56 = vmul.f32 %v1332_v49, %v381_v48 }
 0x135   :  { %v332_v21 = vpop.xlane.xlu0 %331 }
 0x136   :  { %v382_v42 = vadd.f32 %v1685_v41, %v332_v21 }
 0x138   :  { %v430_v53 = vmul.f32 %v1333_v43, %v382_v42 }
 0x139   :  { %v359_v22 = vpop.xlane.xlu0 %358 }
 0x13a   :  { %v391_v24 = vadd.f32 %v1685_v41, %v359_v22  ;;  %v444_v58 = vpack.c.bf16 %v430_v53, %v429_v56 }
 0x13c   :  { %v439_v29 = vmul.f32 %v1352_v25, %v391_v24 }
 0x13d   :  { %v362_v27 = vpop.xlane.xlu0 %361 }
 0x13e   :  { %v392_v28 = vadd.f32 %v1685_v41, %v362_v27 }
 0x140   :  { %v440_v32 = vmul.f32 %v1353_v26, %v392_v28 }
 0x141   :  { %v365_v20 = vpop.xlane.xlu0 %364 }
 0x142   :  { %v449_v34 = vpack.c.bf16 %v440_v32, %v439_v29  ;;  %v393_v35 = vadd.f32 %v1685_v41, %v365_v20 }
 0x144   :  { %1402 = vmatprep.mubr.msk.bf16.mxu1 %vm76_vm2, %v449_v34  ;;  %v441_v44 = vmul.f32 %v1356_v33, %v393_v35 }
 0x145   :  { %v368_v37 = vpop.xlane.xlu0 %367 }
 0x146   :  { %v394_v39 = vadd.f32 %v1685_v41, %v368_v37 }
 0x148   :  { %v442_v45 = vmul.f32 %v1357_v36, %v394_v39 }
 0x14a   :  { %v450_v50 = vpack.c.bf16 %v442_v45, %v441_v44  ;;  %v323_v51 = vpop.xlane.xlu1 %322 }
 0x14b   :  { %v379_v52 = vadd.f32 %v1685_v41, %v323_v51  ;;  %v19_v41 = vstv %s1996_s11 }
 0x14c   :  { %1403 = vmatmul.mubr.msk.bf16.gmra.mrb[8].mxu1 %vm76_vm2, %v450_v50  ;;  %20 = vst [vmem:[#allocation3] sm:$0x1] %v19_v41 }
 0x14d   :  { %v427_v55 = vmul.f32 %v1328_v47, %v379_v52 }
 0x14f   :  { %v443_v57 = vpack.c.bf16 %v428_v54, %v427_v55 }
 0x151   :  { %1390 = vmatprep.mubr.msk.bf16.mxu0 %vm76_vm2, %v443_v57 }
 0x152   :  { %1391 = vmatmul.mubr.msk.bf16.vlgmr.msra.gmra.mrb[4].mxu0 %vm76_vm2, %v444_v58 }
 0x153   :  { %v114_v59 = vpop.f32.mrb[0].mxu0 }
 0x154   :  { %v1384_v60 = vpop.f32.mrb[1].mxu0  ;;  %v115_v8 = vadd.f32 %v1305_v7, %v114_v59 }
 0x155   :  { %v117_v61 = vpop.f32.mrb[2].mxu0 }
 0x156   :  { %v1385_v62 = vpop.f32.mrb[3].mxu0  ;;  %v590_v11 = vcombine.high %v115_v8, %v115_v8  ;;  %v118_v22 = vadd.f32 %v1305_v7, %v117_v61  ;;  %v597_v57 = vrot.slane %v115_v8, %v596_v13 }
 0x158   :  { %v604_v14 = vrot.slane %v590_v11, %v596_v13  ;;  %v646_v26 = vrot.slane %v118_v22, %v596_v13  ;;  %v639_v54 = vcombine.high %v118_v22, %v118_v22  ;;  %v605_v60 = vcombine.high %v597_v57, %v597_v57 }
 0x159   :  { %v613_v62 = vrot.slane %v597_v57, %v596_v13 }
 0x15a   :  { %v606_v15 = vcombine.high %v604_v14, %v604_v14  ;;  %v620_v18 = vrot.slane %v604_v14, %v596_v13  ;;  %v654_v35 = vcombine.high %v646_v26, %v646_v26  ;;  %v662_v38 = vrot.slane %v646_v26, %v596_v13 }
 0x15b   :  { %v653_v55 = vrot.slane %v639_v54, %v596_v13  ;;  %v627_v2 = vrot.slane %v605_v60, %v596_v13  ;;  %v635_v11 = vcombine.high %v613_v62, %v613_v62 }
 0x15c   :  { %v634_v19 = vrot.slane %v606_v15, %v596_v13  ;;  %v636_v21 = vcombine.high %v620_v18, %v620_v18  ;;  %v707_v25 = vrot.slane %v620_v18, %v1547_v9  ;;  %v676_v39 = vrot.slane %v654_v35, %v596_v13 }
 0x15d   :  { %v684_v40 = vcombine.high %v662_v38, %v662_v38  ;;  %v723_v44 = vrot.slane %v662_v38, %v1547_v9  ;;  %v655_v56 = vcombine.high %v653_v55, %v653_v55  ;;  %v669_v58 = vrot.slane %v653_v55, %v596_v13 }
 0x15e   :  { %v638_v23 = vcombine.high %v634_v19, %v634_v19  ;;  %v715_v24 = vrot.slane %v636_v21, %v1547_v9  ;;  %v711_v29 = vrot.slane %v634_v19, %v1547_v9  ;;  %v686_v42 = vcombine.high %v676_v39, %v676_v39 }
 0x15f   :  { %v731_v43 = vrot.slane %v684_v40, %v1547_v9  ;;  %v727_v46 = vrot.slane %v676_v39, %v1547_v9  ;;  %v683_v59 = vrot.slane %v655_v56, %v596_v13  ;;  %v685_v61 = vcombine.high %v669_v58, %v669_v58 }
 0x160   :  { %v719_v27 = vrot.slane %v638_v23, %v1547_v9  ;;  %v735_v45 = vrot.slane %v686_v42, %v1547_v9  ;;  %v739_v7 = vrot.slane %v669_v58, %v1547_v9  ;;  %v637_v19 = vcombine.high %v627_v2, %v627_v2 }
 0x161   :  { %v687_v41 = vcombine.high %v683_v59, %v683_v59  ;;  %v747_v63 = vrot.slane %v685_v61, %v1547_v9  ;;  %v743_v15 = vrot.slane %v683_v59, %v1547_v9  ;;  %v699_v13 = vrot.slane %v635_v11, %v1547_v9 }
 0x162   :  { %v703_v26 = vrot.slane %v637_v19, %v1547_v9 }
 0x163   :  { %v751_v10 = vrot.slane %v687_v41, %v1547_v9 }
 0x1f4   :  { %v1396_v28 = vpop.f32.mrb[0].mxu1 }
 0x1f5   :  { %v1740_v32 = vadd.f32 %v1396_v28, %v715_v24  ;;  %v541_v20 = vpop.f32.mrb[1].mxu1  ;;  %v691_v28 = vrot.slane %v613_v62, %v1547_v9 }
 0x1f6   :  { %v1742_v31 = vadd.f32 %v707_v25, %v541_v20  ;;  %v1397_v34 = vpop.f32.mrb[2].mxu1 }
 0x1f7   :  { %v1744_v33 = vadd.f32 %v1397_v34, %v719_v27  ;;  %v544_v36 = vpop.f32.mrb[3].mxu1  ;;  %v790_v38 = vmax.f32 %v1740_v32, 0.0 }
 0x1f8   :  { %v1746_v37 = vadd.f32 %v711_v29, %v544_v36  ;;  %v695_v36 = vrot.slane %v627_v2, %v1547_v9 }
 0x1f9   :  { %v791_v62 = vmax.f32 %v1744_v33, 0.0 }
 0x203   :  { %v1400_v30 = vpop.f32.mrb[4].mxu1 }
 0x204   :  { %v1752_v47 = vadd.f32 %v1400_v30, %v731_v43  ;;  %v557_v48 = vpop.f32.mrb[5].mxu1 }
 0x205   :  { %v1754_v49 = vadd.f32 %v723_v44, %v557_v48  ;;  %v1401_v50 = vpop.f32.mrb[6].mxu1 }
 0x206   :  { %v1756_v51 = vadd.f32 %v1401_v50, %v735_v45  ;;  %v560_v52 = vpop.f32.mrb[7].mxu1  ;;  %v1324_v45 = vld [vmem:[%s1998_s10] ss:$0 sm:$0xff]  ;;  %v788_v50 = vmax.f32 %v1742_v31, 0.0  ;;  %v794_v55 = vmax.f32 %v1752_v47, 0.0 }
 0x207   :  { %v1758_v53 = vadd.f32 %v727_v46, %v560_v52  ;;  %v813_v54 = vmul.f32 %v1324_v45, %v790_v38  ;;  %v814_v11 = vmul.f32 %v1324_v45, %v791_v62 }
 0x208   :  { %v811_v59 = vmul.f32 %v1324_v45, %v788_v50  ;;  %v795_v60 = vmax.f32 %v1756_v51, 0.0  ;;  %v817_v31 = vmul.f32 %v1324_v45, %v794_v55 }
 0x209   :  { %v841_v58 = vsel %vm320_vm0, %v813_v54, 0.0 }
 0x20a   :  { %v835_v47 = vsel %vm320_vm0, %v811_v59, 0.0  ;;  %v853_v2 = vsel %vm320_vm0, %v817_v31, 0.0 }
 0x21f   :  { %v1404_v14 = vpop.f32.mrb[8].mxu1 }
 0x220   :  { %v1764_v18 = vadd.f32 %v1404_v14, %v747_v63  ;;  %v573_v8 = vpop.f32.mrb[9].mxu1  ;;  %v793_v63 = vmax.f32 %v1758_v53, 0.0  ;;  %v844_v53 = vsel %vm320_vm0, %v814_v11, 0.0 }
 0x221   :  { %v1766_v21 = vadd.f32 %v739_v7, %v573_v8  ;;  %v1405_v22 = vpop.f32.mrb[10].mxu1  ;;  %v818_v7 = vmul.f32 %v1324_v45, %v795_v60  ;;  %v792_v8 = vmax.f32 %v1754_v49, 0.0 }
 0x222   :  { %v1768_v23 = vadd.f32 %v1405_v22, %v751_v10  ;;  %v576_v24 = vpop.f32.mrb[11].mxu1  ;;  %v789_v10 = vmax.f32 %v1746_v37, 0.0  ;;  %v798_v14 = vmax.f32 %v1764_v18, 0.0 }
 0x223   :  { %v1771_v25 = vadd.f32 %v743_v15, %v576_v24  ;;  %v856_v33 = vsel %vm320_vm0, %v818_v7, 0.0  ;;  %v816_v15 = vmul.f32 %v1324_v45, %v793_v63  ;;  %v796_v22 = vmax.f32 %v1766_v21, 0.0 }
 0x224   :  { %v812_v19 = vmul.f32 %v1324_v45, %v789_v10  ;;  %v821_v24 = vmul.f32 %v1324_v45, %v798_v14  ;;  %v815_v18 = vmul.f32 %v1324_v45, %v792_v8 }
 0x225   :  { %v1392_v27 = vpop.f32.mrb[4].mxu0  ;;  %v850_v37 = vsel %vm320_vm0, %v816_v15, 0.0 }
 0x226   :  { %v770_v29 = vadd.f32 %v1392_v27, %v699_v13  ;;  %v525_v20 = vpop.f32.mrb[5].mxu0  ;;  %v838_v13 = vsel %vm320_vm0, %v812_v19, 0.0  ;;  %v865_v27 = vsel %vm320_vm0, %v821_v24, 0.0  ;;  %v847_v49 = vsel %vm320_vm0, %v815_v18, 0.0 }
 0x227   :  { %v768_v34 = vadd.f32 %v691_v28, %v525_v20  ;;  %v1393_v35 = vpop.f32.mrb[6].mxu0  ;;  %v819_v28 = vmul.f32 %v1324_v45, %v796_v22 }
 0x228   :  { %v786_v39 = vmax.f32 %v770_v29, 0.0  ;;  %v771_v40 = vadd.f32 %v1393_v35, %v703_v26  ;;  %v528_v42 = vpop.f32.mrb[7].mxu0  ;;  %v797_v26 = vmax.f32 %v1771_v25, 0.0  ;;  %v799_v29 = vmax.f32 %v1768_v23, 0.0 }
 0x229   :  { %v784_v43 = vmax.f32 %v768_v34, 0.0  ;;  %v769_v44 = vadd.f32 %v695_v36, %v528_v42  ;;  %v859_v21 = vsel %vm320_vm0, %v819_v28, 0.0  ;;  %v1325_v36 = vld [vmem:[#allocation3] ss:$0 sm:$0xff] }
 0x22a   :  { %v809_v30 = vmul.f32 %v1324_v45, %v786_v39  ;;  %v787_v57 = vmax.f32 %v771_v40, 0.0  ;;  %v820_v20 = vmul.f32 %v1324_v45, %v797_v26  ;;  %v822_v35 = vmul.f32 %v1324_v45, %v799_v29 }
 0x22b   :  { %v785_v46 = vmax.f32 %v769_v44, 0.0  ;;  %v807_v48 = vmul.f32 %v1324_v45, %v784_v43 }
 0x22c   :  { %v829_v52 = vsel %vm320_vm0, %v809_v30, 0.0  ;;  %v810_v41 = vmul.f32 %v1324_v45, %v787_v57  ;;  %v862_v34 = vsel %vm320_vm0, %v820_v20, 0.0  ;;  %v868_v25 = vsel %vm320_vm0, %v822_v35, 0.0 }
 0x22d   :  { %830 = vadd.xlane.f32.xlu1 %v829_v52  ;;  %v823_v32 = vsel %vm320_vm0, %v807_v48, 0.0  ;;  %v808_v56 = vmul.f32 %v1324_v45, %v785_v46  ;;  %v930_v45 = vand.u32 127, %v123_v0 }
 0x22e   :  { %824 = vadd.xlane.f32.xlu0 %v823_v32  ;;  %v832_v51 = vsel %vm320_vm0, %v810_v41, 0.0 }
 0x22f   :  { %v826_v61 = vsel %vm320_vm0, %v808_v56, 0.0  ;;  %v1809_v32 = vsub.s32 %v930_v45, %v1527_v1 }
 0x231   :  { %842 = vadd.xlane.f32.xlu1 %v841_v58 }
 0x232   :  { %827 = vadd.xlane.f32.xlu0 %v826_v61 }
 0x235   :  { %836 = vadd.xlane.f32.xlu1 %v835_v47 }
 0x236   :  { %854 = vadd.xlane.f32.xlu0 %v853_v2 }
 0x239   :  { %833 = vadd.xlane.f32.xlu1 %v832_v51 }
 0x23a   :  { %857 = vadd.xlane.f32.xlu0 %v856_v33 }
 0x23d   :  { %845 = vadd.xlane.f32.xlu1 %v844_v53 }
 0x23e   :  { %851 = vadd.xlane.f32.xlu0 %v850_v37 }
 0x241   :  { %839 = vadd.xlane.f32.xlu1 %v838_v13 }
 0x242   :  { %866 = vadd.xlane.f32.xlu0 %v865_v27 }
 0x245   :  { %848 = vadd.xlane.f32.xlu1 %v847_v49 }
 0x246   :  { %860 = vadd.xlane.f32.xlu0 %v859_v21 }
 0x24a   :  { %863 = vadd.xlane.f32.xlu0 %v862_v34 }
 0x24e   :  { %869 = vadd.xlane.f32.xlu0 %v868_v25 }
 0x256   :  { %878 = vperm.xlu1 %1414, %v1325_v36  }
 0x2ba   :  { %v831_v38 = vpop.xlane.xlu1 %830 }
 0x2bb   :  { %v825_v39 = vpop.xlane.xlu0 %824 }
 0x2be   :  { %v843_v40 = vpop.xlane.xlu1 %842 }
 0x2bf   :  { %v828_v42 = vpop.xlane.xlu0 %827 }
 0x2c2   :  { %v837_v43 = vpop.xlane.xlu1 %836 }
 0x2c3   :  { %v855_v23 = vpop.xlane.xlu0 %854 }
 0x2c6   :  { %v834_v44 = vpop.xlane.xlu1 %833 }
 0x2c7   :  { %v858_v30 = vpop.xlane.xlu0 %857 }
 0x2ca   :  { %v846_v46 = vpop.xlane.xlu1 %845 }
 0x2cb   :  { %v852_v48 = vpop.xlane.xlu0 %851 }
 0x2ce   :  { %v840_v50 = vpop.xlane.xlu1 %839 }
 0x2cf   :  { %v867_v52 = vpop.xlane.xlu0 %866 }
 0x2d2   :  { %v849_v54 = vpop.xlane.xlu1 %848 }
 0x2d3   :  { %v861_v55 = vpop.xlane.xlu0 %860 }
 0x2d6   :  { %v879_v56 = vpop.permute.xlu1 %878 }
 0x2d7   :  { %v864_v57 = vpop.xlane.xlu0 %863  ;;  %v1811_v58 = vadd.f32 %v879_v56, %v825_v39  ;;  %v1813_v59 = vadd.f32 %v879_v56, %v828_v42  ;;  %v1815_v60 = vadd.f32 %v879_v56, %v831_v38  ;;  %v1817_v61 = vadd.f32 %v879_v56, %v834_v44 }
 0x2d8   :  { %v1819_v0 = vadd.f32 %v879_v56, %v864_v57  ;;  %v1821_v31 = vadd.f32 %v879_v56, %v837_v43  ;;  %v1823_v1 = vadd.f32 %v879_v56, %v840_v50  ;;  %v1825_v62 = vadd.f32 %v879_v56, %v843_v40 }
 0x2d9   :  { %v1827_v47 = vadd.f32 %v879_v56, %v846_v46  ;;  %v897_v41 = vmul.f32 %v1811_v58, %v1811_v58  ;;  %v898_v63 = vmul.f32 %v1813_v59, %v1813_v59  ;;  %v899_v2 = vmul.f32 %v1815_v60, %v1815_v60 }
 0x2da   :  { %v900_v7 = vmul.f32 %v1817_v61, %v1817_v61  ;;  %v901_v10 = vmul.f32 %v1821_v31, %v1821_v31  ;;  %v902_v51 = vmul.f32 %v1823_v1, %v1823_v1  ;;  %v910_v15 = vmul.f32 %v1819_v0, %v1819_v0 }
 0x2db   :  { %v870_v11 = vpop.xlane.xlu0 %869  ;;  %v934_v14 = vrot.slane %v897_v41, %v1809_v32  ;;  %v938_v33 = vrot.slane %v898_v63, %v1809_v32  ;;  %v903_v8 = vmul.f32 %v1825_v62, %v1825_v62  ;;  %v942_v53 = vrot.slane %v899_v2, %v1809_v32 }
 0x2dc   :  { %v1848_v19 = vadd.f32 %v879_v56, %v870_v11  ;;  %v904_v22 = vmul.f32 %v1827_v47, %v1827_v47  ;;  %v946_v37 = vrot.slane %v900_v7, %v1809_v32  ;;  %v950_v24 = vrot.slane %v901_v10, %v1809_v32 }
 0x2dd   :  { %v954_v13 = vrot.slane %v902_v51, %v1809_v32  ;;  %v996_v18 = vsel %vm995_vm3, %v938_v33, %v934_v14  ;;  %v1856_v26 = vadd.f32 %v879_v56, %v849_v54  ;;  %v1858_v27 = vadd.f32 %v879_v56, %v852_v48 }
 0x2de   :  { %v998_v28 = vsel %vm997_vm4, %v942_v53, %v996_v18  ;;  %v1861_v49 = vadd.f32 %v879_v56, %v855_v23  ;;  %v1863_v29 = vadd.f32 %v879_v56, %v858_v30  ;;  %v1865_v21 = vadd.f32 %v879_v56, %v861_v55 }
 0x2df   :  { %v958_v20 = vrot.slane %v903_v8, %v1809_v32  ;;  %v1000_v34 = vsel %vm999_vm5, %v946_v37, %v998_v28  ;;  %v1869_v35 = vadd.f32 %v879_v56, %v867_v52  ;;  %v905_v25 = vmul.f32 %v1856_v26, %v1856_v26 }
 0x2e0   :  { %v1002_v36 = vsel %vm1001_vm6, %v950_v24, %v1000_v34  ;;  %v906_v38 = vmul.f32 %v1858_v27, %v1858_v27  ;;  %v907_v39 = vmul.f32 %v1861_v49, %v1861_v49  ;;  %v908_v40 = vmul.f32 %v1863_v29, %v1863_v29 }
 0x2e1   :  { %v962_v42 = vrot.slane %v904_v22, %v1809_v32  ;;  %v1004_v43 = vsel %vm1003_vm7, %v954_v13, %v1002_v36  ;;  %v909_v23 = vmul.f32 %v1865_v21, %v1865_v21  ;;  %v966_v44 = vrot.slane %v905_v25, %v1809_v32 }
 0x2e2   :  { %v912_v30 = vmul.f32 %v1848_v19, %v1848_v19  ;;  %v1006_v46 = vsel %vm1005_vm8, %v958_v20, %v1004_v43  ;;  %v970_v48 = vrot.slane %v906_v38, %v1809_v32  ;;  %v974_v50 = vrot.slane %v907_v39, %v1809_v32 }
 0x2e3   :  { %v1008_v52 = vsel %vm1007_vm9, %v962_v42, %v1006_v46  ;;  %v911_v45 = vmul.f32 %v1869_v35, %v1869_v35  ;;  %v978_v55 = vrot.slane %v908_v40, %v1809_v32  ;;  %v982_v57 = vrot.slane %v909_v23, %v1809_v32 }
 0x2e4   :  { %v1019_v54 = vsel %vm1018_vm10, %v1008_v52, 0.0  ;;  %v1009_v56 = vsel %vm995_vm3, %v970_v48, %v966_v44  ;;  %v986_v63 = vrot.slane %v910_v15, %v1809_v32  ;;  %v994_v2 = vrot.slane %v912_v30, %v1809_v32 }
 0x2e5   :  { %1020 = vadd.xlane.f32.xlu0 %v1019_v54  ;;  %v1010_v41 = vsel %vm997_vm4, %v974_v50, %v1009_v56  ;;  %v990_v10 = vrot.slane %v911_v45, %v1809_v32 }
 0x2e6   :  { %v1011_v7 = vsel %vm999_vm5, %v978_v55, %v1010_v41 }
 0x2e7   :  { %v1012_v51 = vsel %vm1001_vm6, %v982_v57, %v1011_v7 }
 0x2e8   :  { %v1013_v11 = vsel %vm1003_vm7, %v986_v63, %v1012_v51 }
 0x2e9   :  { %v1014_v14 = vsel %vm1005_vm8, %v990_v10, %v1013_v11 }
 0x2ea   :  { %v1015_v33 = vsel %vm1007_vm9, %v994_v2, %v1014_v14 }
 0x2eb   :  { %v1022_v8 = vsel %vm1018_vm10, %v1015_v33, 0.0 }
 0x2ec   :  { %1023 = vadd.xlane.f32.xlu0 %v1022_v8 }
 0x372   :  { %v1021_v53 = vpop.xlane.xlu0 %1020 }
 0x373   :  { %1421 = vrsqrt.f32 %v1021_v53  ;;  %vm1027_vm11 = vcmp.eq.f32.partialorder %v1021_v53, inf  ;;  %v1030_v24 = vand.u32 2147483648, %v1021_v53  ;;  %vm1029_vm12 = vcmp.eq.f32.partialorder %v1021_v53, 0.0 }
 0x379   :  { %v1024_v15 = vpop.xlane.xlu0 %1023 }
 0x37a   :  { %1423 = vrsqrt.f32 %v1024_v15  ;;  %vm1034_vm13 = vcmp.eq.f32.partialorder %v1024_v15, inf  ;;  %v1037_v39 = vand.u32 2147483648, %v1024_v15  ;;  %vm1036_vm14 = vcmp.eq.f32.partialorder %v1024_v15, 0.0 }
 0x37d   :  { %v1422_v22 = vpop.eup %1421 }
 0x37e   :  { %v1026_v37 = vmul.f32 %v1422_v22, %v1021_v53 }
 0x380   :  { %v1028_v13 = vsel %vm1027_vm11, %v1021_v53, %v1026_v37 }
 0x381   :  { %v1031_v18 = vsel %vm1029_vm12, %v1030_v24, %v1028_v13 }
 0x382   :  { %v1907_v28 = vmax.f32 %v1031_v18, 1e-12 }
 0x384   :  { %v1424_v20 = vpop.eup %1423  ;;  %v1050_v34 = vrot.slane %v1907_v28, %v1552_v12  ;;  %v1046_v25 = vrot.slane %v1907_v28, %v1547_v9  ;;  %v1054_v36 = vrot.slane %v1907_v28, %v1560_v16  ;;  %v1058_v43 = vrot.slane %v1907_v28, %v1563_v17 }
 0x385   :  { %v1033_v38 = vmul.f32 %v1424_v20, %v1024_v15  ;;  %v1062_v46 = vrot.slane %v1907_v28, %v1533_v3  ;;  %v1066_v52 = vrot.slane %v1907_v28, %v1539_v5  ;;  %v1070_v57 = vrot.slane %v1907_v28, %v1536_v4 }
 0x386   :  { %1425 = vrcp.f32 %v1050_v34 }
 0x387   :  { %v1035_v40 = vsel %vm1034_vm13, %v1024_v15, %v1033_v38  ;;  %1427 = vrcp.f32 %v1046_v25 }
 0x388   :  { %v1038_v42 = vsel %vm1036_vm14, %v1037_v39, %v1035_v40  ;;  %1429 = vrcp.f32 %v1054_v36 }
 0x389   :  { %v1040_v23 = vmax.f32 %v1038_v42, 1e-12  ;;  %1431 = vrcp.f32 %v1058_v43 }
 0x38b   :  { %v1098_v44 = vrot.slane %v1040_v23, %v1539_v5  ;;  %v1102_v30 = vrot.slane %v1040_v23, %v1536_v4  ;;  %v1106_v48 = vrot.slane %v1040_v23, %v1542_v6  ;;  %v1082_v4 = vrot.slane %v1040_v23, %v1552_v12 }
 0x38d   :  { %1433 = vrcp.f32 %v1098_v44 }
 0x38e   :  { %1435 = vrcp.f32 %v1102_v30 }
 0x38f   :  { %1437 = vrcp.f32 %v1062_v46 }
 0x390   :  { %v1426_v50 = vpop.eup %1425  ;;  %1439 = vrcp.f32 %v1106_v48 }
 0x391   :  { %v1428_v45 = vpop.eup %1427  ;;  %v1126_v54 = vmul.f32 %v1426_v50, %v1813_v59  ;;  %1441 = vrcp.f32 %v1066_v52  ;;  %v1078_v59 = vrot.slane %v1040_v23, %v1547_v9  ;;  %v1086_v9 = vrot.slane %v1040_v23, %v1560_v16 }
 0x392   :  { %v1430_v55 = vpop.eup %1429  ;;  %v1124_v56 = vmul.f32 %v1428_v45, %v1811_v58  ;;  %1443 = vrcp.f32 %v1070_v57  ;;  %v1074_v16 = vrot.slane %v1907_v28, %v1542_v6 }
 0x393   :  { %1175 = vperm.xlu1 %1414, %v1126_v54   ;;  %v1128_v41 = vmul.f32 %v1430_v55, %v1815_v60  ;;  %v1432_v63 = vpop.eup %1431  ;;  %1445 = vrcp.f32 %v1078_v59 }
 0x394   :  { %1172 = vperm.xlu0 %1415, %v1124_v56   ;;  %v1130_v58 = vmul.f32 %v1432_v63, %v1817_v61  ;;  %1447 = vrcp.f32 %v1082_v4 }
 0x395   :  { %1449 = vrcp.f32 %v1086_v9 }
 0x397   :  { %v1434_v2 = vpop.eup %1433  ;;  %1178 = vperm.xlu1 %1414, %v1128_v41  }
 0x398   :  { %v1150_v5 = vmul.f32 %v1434_v2, %v1819_v0  ;;  %v1436_v7 = vpop.eup %1435 }
 0x399   :  { %v1438_v10 = vpop.eup %1437  ;;  %v1152_v51 = vmul.f32 %v1436_v7, %v1869_v35  ;;  %v1090_v35 = vrot.slane %v1040_v23, %v1563_v17 }
 0x39a   :  { %1211 = vperm.xlu0 %1415, %v1150_v5   ;;  %v1440_v60 = vpop.eup %1439  ;;  %v1132_v11 = vmul.f32 %v1438_v10, %v1821_v31  ;;  %v1094_v31 = vrot.slane %v1040_v23, %v1533_v3 }
 0x39b   :  { %1181 = vperm.xlu1 %1414, %v1130_v58   ;;  %v1442_v14 = vpop.eup %1441  ;;  %v1154_v0 = vmul.f32 %v1440_v60, %v1848_v19  ;;  %1451 = vrcp.f32 %v1090_v35 }
 0x39c   :  { %v1134_v61 = vmul.f32 %v1442_v14, %v1823_v1  ;;  %v1444_v33 = vpop.eup %1443  ;;  %1453 = vrcp.f32 %v1094_v31 }
 0x39d   :  { %v1136_v12 = vmul.f32 %v1444_v33, %v1825_v62  ;;  %v1446_v8 = vpop.eup %1445  ;;  %1455 = vrcp.f32 %v1074_v16 }
 0x39e   :  { %1214 = vperm.xlu0 %1415, %v1152_v51   ;;  %v1140_v19 = vmul.f32 %v1446_v8, %v1856_v26  ;;  %v1448_v53 = vpop.eup %1447 }
 0x39f   :  { %1184 = vperm.xlu1 %1414, %v1132_v11   ;;  %v1142_v1 = vmul.f32 %v1448_v53, %v1858_v27  ;;  %v1450_v15 = vpop.eup %1449 }
 0x3a0   :  { %v1144_v17 = vmul.f32 %v1450_v15, %v1861_v49 }
 0x3a2   :  { %1217 = vperm.xlu0 %1415, %v1154_v0  }
 0x3a3   :  { %1187 = vperm.xlu1 %1414, %v1134_v61  }
 0x3a5   :  { %v1452_v62 = vpop.eup %1451 }
 0x3a6   :  { %v1146_v22 = vmul.f32 %v1452_v62, %v1863_v29  ;;  %v1454_v3 = vpop.eup %1453 }
 0x3a7   :  { %1190 = vperm.xlu1 %1414, %v1136_v12   ;;  %v1148_v26 = vmul.f32 %v1454_v3, %v1865_v21  ;;  %v1456_v37 = vpop.eup %1455 }
 0x3a8   :  { %v1138_v24 = vmul.f32 %v1456_v37, %v1827_v47 }
 0x3ab   :  { %1196 = vperm.xlu1 %1414, %v1140_v19  }
 0x3af   :  { %1199 = vperm.xlu1 %1414, %v1142_v1  }
 0x3b3   :  { %1202 = vperm.xlu1 %1414, %v1144_v17  }
 0x3b7   :  { %1205 = vperm.xlu1 %1414, %v1146_v22  }
 0x3bb   :  { %1208 = vperm.xlu1 %1414, %v1148_v26  }
 0x3bf   :  { %1193 = vperm.xlu1 %1414, %v1138_v24  }
 0x412   :  { %v1176_v6 = vpop.permute.xlu1 %1175 }
 0x413   :  { %v1173_v49 = vpop.permute.xlu0 %1172  ;;  %v1226_v40 = vrot.slane %v1176_v6, %v1809_v32 }
 0x414   :  { %v1222_v47 = vrot.slane %v1173_v49, %v1809_v32 }
 0x416   :  { %v1179_v27 = vpop.permute.xlu1 %1178  ;;  %v1283_v52 = vsel %vm995_vm3, %v1226_v40, %v1222_v47 }
 0x417   :  { %v1230_v43 = vrot.slane %v1179_v27, %v1809_v32 }
 0x419   :  { %v1212_v36 = vpop.permute.xlu0 %1211  ;;  %v1284_v57 = vsel %vm997_vm4, %v1230_v43, %v1283_v52 }
 0x41a   :  { %v1182_v13 = vpop.permute.xlu1 %1181  ;;  %v1274_v41 = vrot.slane %v1212_v36, %v1809_v32 }
 0x41b   :  { %v1234_v30 = vrot.slane %v1182_v13, %v1809_v32 }
 0x41d   :  { %v1215_v38 = vpop.permute.xlu0 %1214  ;;  %v1285_v5 = vsel %vm999_vm5, %v1234_v30, %v1284_v57 }
 0x41e   :  { %v1185_v18 = vpop.permute.xlu1 %1184  ;;  %v1278_v59 = vrot.slane %v1215_v38, %v1809_v32 }
 0x41f   :  { %v1238_v46 = vrot.slane %v1185_v18, %v1809_v32 }
 0x421   :  { %v1218_v45 = vpop.permute.xlu0 %1217  ;;  %v1286_v58 = vsel %vm1001_vm6, %v1238_v46, %v1285_v5 }
 0x422   :  { %v1188_v28 = vpop.permute.xlu1 %1187  ;;  %v1282_v10 = vrot.slane %v1218_v45, %v1809_v32 }
 0x423   :  { %v1242_v54 = vrot.slane %v1188_v28, %v1809_v32 }
 0x425   :  { %v1287_v60 = vsel %vm1003_vm7, %v1242_v54, %v1286_v58 }
 0x426   :  { %v1191_v20 = vpop.permute.xlu1 %1190 }
 0x427   :  { %v1246_v63 = vrot.slane %v1191_v20, %v1809_v32 }
 0x429   :  { %v1288_v0 = vsel %vm1005_vm8, %v1246_v63, %v1287_v60 }
 0x42a   :  { %v1197_v34 = vpop.permute.xlu1 %1196 }
 0x42b   :  { %v1254_v23 = vrot.slane %v1197_v34, %v1809_v32 }
 0x42e   :  { %v1200_v25 = vpop.permute.xlu1 %1199 }
 0x42f   :  { %v1258_v39 = vrot.slane %v1200_v25, %v1809_v32 }
 0x431   :  { %v1290_v48 = vsel %vm995_vm3, %v1258_v39, %v1254_v23 }
 0x432   :  { %v1203_v29 = vpop.permute.xlu1 %1202 }
 0x433   :  { %v1262_v42 = vrot.slane %v1203_v29, %v1809_v32 }
 0x435   :  { %v1291_v55 = vsel %vm997_vm4, %v1262_v42, %v1290_v48 }
 0x436   :  { %v1206_v21 = vpop.permute.xlu1 %1205 }
 0x437   :  { %v1266_v44 = vrot.slane %v1206_v21, %v1809_v32 }
 0x439   :  { %v1292_v2 = vsel %vm999_vm5, %v1266_v44, %v1291_v55 }
 0x43a   :  { %v1209_v50 = vpop.permute.xlu1 %1208 }
 0x43b   :  { %v1270_v56 = vrot.slane %v1209_v50, %v1809_v32 }
 0x43d   :  { %v1293_v7 = vsel %vm1001_vm6, %v1270_v56, %v1292_v2 }
 0x43e   :  { %v1294_v51 = vsel %vm1003_vm7, %v1274_v41, %v1293_v7  ;;  %v1194_v4 = vpop.permute.xlu1 %1193 }
 0x43f   :  { %v1295_v11 = vsel %vm1005_vm8, %v1278_v59, %v1294_v51  ;;  %v1250_v14 = vrot.slane %v1194_v4, %v1809_v32 }
 0x440   :  { %v1296_v9 = vsel %vm1007_vm9, %v1282_v10, %v1295_v11 }
 0x441   :  { %v1289_v61 = vsel %vm1007_vm9, %v1250_v14, %v1288_v0  ;;  %1300 = vst.msk [vmem:[%s1999_s12 + $0x8] sm:$0xff] %vm1018_vm10, %v1296_v9 }
 0x442   :  { %1299 = vst.msk [vmem:[%s1999_s12] sm:$0xff] %vm1018_vm10, %v1289_v61 }

</bundles_post_ra>
